<compile_context>
chip_gen: v5e
topology: v5e:2x2
jax: 0.10.0
libtpu: 0.0.40
codegen_flags: <defaults>
</compile_context>

<pallas_src>
import jax
import jax.numpy as jnp
from jax.experimental import pallas as pl
from jax.experimental.pallas import tpu as pltpu

IN_F = 2
HIDDEN = 200
OUT_F = 1

HID_P = 256      # hidden padded to a clean multiple of 128 lanes
IN_P = 8         # input channels padded to one sublane group (x0, x1, 1, 0...)
ONES = HIDDEN    # padded slot used as the constant-1 "bias" channel
MAX_TM = 4096    # per-step batch-tile cap (~8 MiB intermediates; v7x-safe)


def mlp_kernel(x_ref, w1_ref, w2_ref, w3_ref, o_ref):
    """Fused 3-layer MLP in transposed (features, batch) layout.

    x_ref : (IN_P, tm)      rows 0..1 = x^T, row 2 = 1.0 (bias channel), rest 0
    w1_ref: (HID_P, IN_P)   [:200,:2]=W1, [:200,2]=b1, [200,2]=1 (ones channel)
    w2_ref: (HID_P, HID_P)  [:200,:200]=W2, [:200,200]=b2, [200,200]=1
    w3_ref: (8, HID_P)      [0,:200]=W3, [0,200]=b3, rows 1..7 = 0
    o_ref : (1, tm)         lane-dense output row
    """
    x = x_ref[...]
    # fc1 + ReLU on the MXU: (256, 8) @ (8, tm); bias folded via ones channel.
    h1 = jnp.maximum(
        jnp.dot(w1_ref[...], x, preferred_element_type=jnp.float32), 0.0)
    # fc2 + ReLU on the MXU: (256, 256) @ (256, tm).
    h2 = jnp.maximum(
        jnp.dot(w2_ref[...], h1, preferred_element_type=jnp.float32), 0.0)
    # fc3: (8, 256) @ (256, tm) -> take the single live row (lane-dense store).
    y = jnp.dot(w3_ref[...], h2, preferred_element_type=jnp.float32)  # (8, tm)
    o_ref[...] = y[0:1, :].astype(o_ref.dtype)


def _choose_tile(n):
    # Aim for exactly 2 tiles (one per v7x TensorCore; 2 cheap serial steps on
    # single-TC v5e/v6e). tm must be a multiple of 128 (lane-dense last dim).
    half = (n + 1) // 2
    tm = max(128, ((half + 127) // 128) * 128)
    return min(tm, MAX_TM)


def prepare_params(params):
    """One-time: pad, transpose and fold biases into augmented weights.

    params are PyTorch-shaped: W1 (200,2), b1 (200,), W2 (200,200), b2 (200,),
    W3 (1,200), b3 (1,).
    """
    W1, b1, W2, b2, W3, b3 = params

    w1a = jnp.zeros((HID_P, IN_P), jnp.float32)
    w1a = w1a.at[:HIDDEN, :IN_F].set(W1)
    w1a = w1a.at[:HIDDEN, IN_F].set(b1)
    w1a = w1a.at[ONES, IN_F].set(1.0)       # h1[ONES] = relu(1) = 1

    w2a = jnp.zeros((HID_P, HID_P), jnp.float32)
    w2a = w2a.at[:HIDDEN, :HIDDEN].set(W2)
    w2a = w2a.at[:HIDDEN, ONES].set(b2)
    w2a = w2a.at[ONES, ONES].set(1.0)       # h2[ONES] = relu(1) = 1

    w3a = jnp.zeros((8, HID_P), jnp.float32)
    w3a = w3a.at[0, :HIDDEN].set(W3[0])
    w3a = w3a.at[0, ONES].set(b3[0])
    return (w1a, w2a, w3a)


@jax.jit
def mlp_forward(x, packed):
    """x: (N, 2) float32, packed = prepare_params(params). Returns (N, 1)."""
    w1a, w2a, w3a = packed
    N = x.shape[0]
    tm = _choose_tile(N)
    n_tiles = pl.cdiv(N, tm)
    n_pad = n_tiles * tm

    # Homogeneous, transposed input slab: rows 0..1 = x^T, row 2 = ones.
    xt = jnp.zeros((IN_P, n_pad), jnp.float32)
    xt = xt.at[:IN_F, :N].set(x.T)
    xt = xt.at[IN_F, :].set(1.0)

    y = pl.pallas_call(
        mlp_kernel,
        out_shape=jax.ShapeDtypeStruct((1, n_pad), jnp.float32),
        grid_spec=pltpu.PrefetchScalarGridSpec(
            num_scalar_prefetch=0,
            grid=(n_tiles,),
            in_specs=[
                pl.BlockSpec((IN_P, tm), lambda i: (0, i)),       # x tile
                pl.BlockSpec((HID_P, IN_P), lambda i: (0, 0)),    # w1 (resident)
                pl.BlockSpec((HID_P, HID_P), lambda i: (0, 0)),   # w2 (resident)
                pl.BlockSpec((8, HID_P), lambda i: (0, 0)),       # w3 (resident)
            ],
            out_specs=pl.BlockSpec((1, tm), lambda i: (0, i)),    # lane-dense row
        ),
        compiler_params=pltpu.CompilerParams(
            dimension_semantics=("parallel",),
        ),
    )(xt, w1a, w2a, w3a)

    return y[0, :N].reshape(N, OUT_F)


def init_params(key):
    """Deterministic PyTorch-Linear-style init: U(-1/sqrt(fan_in), 1/sqrt(fan_in))."""
    k = jax.random.split(key, 6)

    def lin(kw, kb, fan_in, fan_out):
        bound = 1.0 / float(fan_in) ** 0.5
        W = jax.random.uniform(kw, (fan_out, fan_in), jnp.float32, -bound, bound)
        b = jax.random.uniform(kb, (fan_out,), jnp.float32, -bound, bound)
        return W, b

    W1, b1 = lin(k[0], k[1], IN_F, HIDDEN)
    W2, b2 = lin(k[2], k[3], HIDDEN, HIDDEN)
    W3, b3 = lin(k[4], k[5], HIDDEN, OUT_F)
    return (W1, b1, W2, b2, W3, b3)


def reference_forward(x, params):
    W1, b1, W2, b2, W3, b3 = params
    hi = jax.lax.Precision.HIGHEST
    h1 = jnp.maximum(jnp.dot(x, W1.T, precision=hi) + b1, 0.0)
    h2 = jnp.maximum(jnp.dot(h1, W2.T, precision=hi) + b2, 0.0)
    return jnp.dot(h2, W3.T, precision=hi) + b3


if __name__ == "__main__":
    key = jax.random.PRNGKey(0)
    kx, kp = jax.random.split(key)

    # Small-scale analogue of the original X = 20*(rand(5000,2)-0.5).
    # N is deliberately not a multiple of the chosen 512-row tile, so batch
    # padding and the 2-tile "parallel" grid are both exercised.
    N = 1000
    x = 20.0 * (jax.random.uniform(kx, (N, IN_F), jnp.float32) - 0.5)

    params = init_params(kp)
    packed = prepare_params(params)   # one-time weight prep (hoisted out of forward)

    y = mlp_forward(x, packed)
    y = jax.block_until_ready(y)

    y_ref = reference_forward(x, params)
    assert y.shape == (N, OUT_F)
    assert jnp.allclose(y, y_ref, atol=1e-3, rtol=1e-4), "mismatch vs reference"

    print("KERNEL_OK")
</pallas_src>

<mosaic_0001>
module attributes {stable_mosaic.version = 11 : i64} {
  func.func @mlp_kernel(%arg0: i32, %arg1: memref<8x512xf32, #tpu.memory_space<vmem>>, %arg2: memref<256x8xf32, #tpu.memory_space<vmem>>, %arg3: memref<256x256xf32, #tpu.memory_space<vmem>>, %arg4: memref<8x256xf32, #tpu.memory_space<vmem>>, %arg5: memref<1x512xf32, #tpu.memory_space<vmem>>) attributes {dimension_semantics = [#tpu.dimension_semantics<parallel>], iteration_bounds = array<i64: 2>, scalar_prefetch = 0 : i64, scratch_operands = 0 : i64, tpu.core_type = #tpu.core_type<tc>, window_params = [{transform_indices = @transform_0, window_bounds = array<i64: 8, 512>}, {pipeline_mode = #tpu.pipeline_mode<synchronous>, transform_indices = @transform_1, window_bounds = array<i64: 256, 8>}, {pipeline_mode = #tpu.pipeline_mode<synchronous>, transform_indices = @transform_2, window_bounds = array<i64: 256, 256>}, {pipeline_mode = #tpu.pipeline_mode<synchronous>, transform_indices = @transform_3, window_bounds = array<i64: 8, 256>}, {transform_indices = @transform_4, window_bounds = array<i64: 1, 512>}]} {
    %c0 = arith.constant 0 : index
    %c0_0 = arith.constant 0 : index
    %0 = vector.load %arg1[%c0, %c0_0] : memref<8x512xf32, #tpu.memory_space<vmem>>, vector<8x512xf32>
    %c0_1 = arith.constant 0 : index
    %c0_2 = arith.constant 0 : index
    %1 = vector.load %arg2[%c0_1, %c0_2] : memref<256x8xf32, #tpu.memory_space<vmem>>, vector<256x8xf32>
    %cst = arith.constant dense<0.000000e+00> : vector<256x512xf32>
    %2 = tpu.matmul %1, %0, %cst {dimension_numbers = #tpu.dot_dimension_numbers<[1], [0], [0], [1], [0, 0, 1, 1], [], []>} : vector<256x8xf32>, vector<8x512xf32>, vector<256x512xf32> -> vector<256x512xf32>
    %cst_3 = arith.constant 0.000000e+00 : f32
    %3 = vector.broadcast %cst_3 : f32 to vector<256x512xf32>
    %4 = arith.maximumf %2, %3 : vector<256x512xf32>
    %c0_4 = arith.constant 0 : index
    %c0_5 = arith.constant 0 : index
    %5 = vector.load %arg3[%c0_4, %c0_5] : memref<256x256xf32, #tpu.memory_space<vmem>>, vector<256x256xf32>
    %cst_6 = arith.constant dense<0.000000e+00> : vector<256x512xf32>
    %6 = tpu.matmul %5, %4, %cst_6 {dimension_numbers = #tpu.dot_dimension_numbers<[1], [0], [0], [1], [0, 0, 1, 1], [], []>} : vector<256x256xf32>, vector<256x512xf32>, vector<256x512xf32> -> vector<256x512xf32>
    %cst_7 = arith.constant 0.000000e+00 : f32
    %7 = vector.broadcast %cst_7 : f32 to vector<256x512xf32>
    %8 = arith.maximumf %6, %7 : vector<256x512xf32>
    %c0_8 = arith.constant 0 : index
    %c0_9 = arith.constant 0 : index
    %9 = vector.load %arg4[%c0_8, %c0_9] : memref<8x256xf32, #tpu.memory_space<vmem>>, vector<8x256xf32>
    %cst_10 = arith.constant dense<0.000000e+00> : vector<8x512xf32>
    %10 = tpu.matmul %9, %8, %cst_10 {dimension_numbers = #tpu.dot_dimension_numbers<[1], [0], [0], [1], [0, 0, 1, 1], [], []>} : vector<8x256xf32>, vector<256x512xf32>, vector<8x512xf32> -> vector<8x512xf32>
    %11 = vector.extract_strided_slice %10 {offsets = [0, 0], sizes = [1, 512], strides = [1, 1]} : vector<8x512xf32> to vector<1x512xf32>
    %c0_11 = arith.constant 0 : index
    %c0_12 = arith.constant 0 : index
    %12 = vector.load %arg5[%c0_11, %c0_12] : memref<1x512xf32, #tpu.memory_space<vmem>>, vector<1x512xf32>
    tpu.vector_store %arg5[%c0_11, %c0_12], %11 {strides = array<i32>} : memref<1x512xf32, #tpu.memory_space<vmem>>, vector<1x512xf32>,
    return
  }
  func.func @transform_0(%arg0: i32) -> (i32, i32) {
    %c0_i32 = arith.constant 0 : i32
    %c0_i32_0 = arith.constant 0 : i32
    return %c0_i32, %arg0 : i32, i32
  }
  func.func @transform_1(%arg0: i32) -> (i32, i32) {
    %c0_i32 = arith.constant 0 : i32
    %c0_i32_0 = arith.constant 0 : i32
    %c0_i32_1 = arith.constant 0 : i32
    return %c0_i32, %c0_i32_0 : i32, i32
  }
  func.func @transform_2(%arg0: i32) -> (i32, i32) {
    %c0_i32 = arith.constant 0 : i32
    %c0_i32_0 = arith.constant 0 : i32
    %c0_i32_1 = arith.constant 0 : i32
    return %c0_i32, %c0_i32_0 : i32, i32
  }
  func.func @transform_3(%arg0: i32) -> (i32, i32) {
    %c0_i32 = arith.constant 0 : i32
    %c0_i32_0 = arith.constant 0 : i32
    %c0_i32_1 = arith.constant 0 : i32
    return %c0_i32, %c0_i32_0 : i32, i32
  }
  func.func @transform_4(%arg0: i32) -> (i32, i32) {
    %c0_i32 = arith.constant 0 : i32
    %c0_i32_0 = arith.constant 0 : i32
    return %c0_i32, %arg0 : i32, i32
  }
}

</mosaic_0001>

<bundles_post_ra>
// kernel: mlp_forward.1
= control target key start
LH: loop header
LB: loop body
LE: loop exit
PB: predicated region body
PF: predicated region fallthrough
CT: control target
= control target key end

     0   :  { %9 = vsyncpa [#allocation3], 0  ;;  %s2499_s15 = smov 0   ;;  %s3905_s0 = inlined_call_operand.vmem [shape: f32[8,1024], index: 0, kind: input, shape index: {}]   ;;  %s3906_s1 = inlined_call_operand.vmem [shape: f32[256,8], index: 1, kind: input, shape index: {}]   ;;  %s3907_s2 = inlined_call_operand.hbm [shape: f32[256,256], index: 2, kind: input, shape index: {}]   ;;  %s3908_s3 = inlined_call_operand.vmem [shape: f32[8,256], index: 3, kind: input, shape index: {}]   ;;  %s3909_s4 = inlined_call_operand.vmem [shape: f32[1,1024], index: 4, kind: output, shape index: {}]  }
   0x1 LB: > { %s149_s18 = sshll.u32 %s3907_s2, 4  ;;  %s2268_s19 = sadd.s32 4294967295, %s2469_s15   ;;  %s2469_s15 = sphi %s2499_s15, %s15_s15   ;;  %s150_s18 = int_to_ptr.hbm [resolvable:$true] %s149_s18 }
   0x2   : > { %p2270_p0 = scmp.ge.s32.totalorder %s2469_s15, 1  ;;  %p135_p1 = scmp.lt.s32.totalorder %s2469_s15, 3 }
   0x3   : > { %p2416_p2 = scmp.eq.s32.totalorder %s2268_s19, 0  ;;  %s2471_s20 = smov [#allocation2]  }
   0x4   : > { %p136_p3 = pnand %p2270_p0, %p135_p1  ;;  %s151_s21 = sshll.u32 %s2471_s20, 4  ;;  %s152_s21 = int_to_ptr.vmem [resolvable:$true] %s151_s21 }
   0x5   : > { %s2472_s22 = smov 256   ;;  %s2473_s23 = smov 16  }
   0x6   : > { %p2412_p4 = pneg %p136_p3  ;;  %179 = sbr.rel (%p136_p3) target bundleno = 1237 (0x4d5), region = 36 }
   0x8   : > { %p2413_p5 = pnand %p2416_p2, %p2412_p4 }
   0xa   : > { %2415 = dma.hbm_to_vmem [thread:$0]  (!%p2413_p5), %s150_s18, 8192, %s152_s21, [#allocation3], %s2472_s22, %s2472_s22, %s2473_s23  }
   0xb   : > { %2464 = dma.done.wait (%p2416_p2), [#allocation3], 8192  }
   0xc   : > { %2466 = vsyncadd (%p2416_p2), [#allocation3], 4294959104  ;;  %s2275_s24 = sshll.u32 %s2268_s19, 2  ;;  %vm252_vm0 = vcmask 64512   ;;  %v220_v2 = vld [vmem:[%s3906_s1] sm:$0xff]  ;;  %v221_v5 = vld [vmem:[%s3906_s1 + $0x8] sm:$0xff] }
   0xd   : > { %p206_p6 = scmp.lt.s32.totalorder %s2275_s24, 7  ;;  %v222_v6 = vld [vmem:[%s3906_s1 + $0x10] sm:$0xff]  ;;  %v223_v7 = vld [vmem:[%s3906_s1 + $0x18] sm:$0xff]  ;;  %v224_v8 = vld [vmem:[%s3906_s1 + $0x20] sm:$0xff]  ;;  %vm2194_vm1 = vcmask 1040384   ;;  %vm2196_vm2 = vcmask 1042434  }
   0xe   : > { %v225_v9 = vld [vmem:[%s3906_s1 + $0x28] sm:$0xff]  ;;  %v226_v10 = vld [vmem:[%s3906_s1 + $0x30] sm:$0xff]  ;;  %v227_v11 = vld [vmem:[%s3906_s1 + $0x38] sm:$0xff]  ;;  %vm2198_vm3 = vcmask 1041408  }
   0xf   : > { %s4195_s24 = smov (!%p206_p6, %s2275_s24), 7  ;;  %v228_v12 = vld [vmem:[%s3906_s1 + $0x40] sm:$0xff]  ;;  %v229_v13 = vld [vmem:[%s3906_s1 + $0x48] sm:$0xff]  ;;  %v230_v14 = vld [vmem:[%s3906_s1 + $0x50] sm:$0xff] }
  0x10   : > { %s2276_s25 = sshll.u32 %s4195_s24, 3  ;;  %v231_v15 = vld [vmem:[%s3906_s1 + $0x58] sm:$0xff]  ;;  %v232_v16 = vld [vmem:[%s3906_s1 + $0x60] sm:$0xff]  ;;  %v233_v17 = vld [vmem:[%s3906_s1 + $0x68] sm:$0xff]  ;;  %s214_s27 = scalar_lea.vmem %s3909_s4, %s4195_s24 }
  0x11   : > { %s209_s28 = scalar_lea.vmem %s3905_s0, %s2276_s25  ;;  %v234_v18 = vld [vmem:[%s3906_s1 + $0x70] sm:$0xff]  ;;  %v235_v19 = vld [vmem:[%s3906_s1 + $0x78] sm:$0xff]  ;;  %v236_v22 = vld [vmem:[%s3906_s1 + $0x80] sm:$0xff] }
  0x12   : > { %v216_v0 = vld [vmem:[%s209_s28] sm:$0xff]  ;;  %v217_v1 = vld [vmem:[%s209_s28 + $0x8] sm:$0xff]  ;;  %v219_v3 = vld [vmem:[%s209_s28 + $0x18] sm:$0xff] }
  0x13   : > { %364 = vmatpush.msra.mxu0 %v216_v0  ;;  %477 = vmatpush.msra.mxu1 %v217_v1  ;;  %v218_v4 = vld [vmem:[%s209_s28 + $0x10] sm:$0xff]  ;;  %v237_v25 = vld [vmem:[%s3906_s1 + $0x88] sm:$0xff]  ;;  %v239_v35 = vld [vmem:[%s3906_s1 + $0x98] sm:$0xff] }
  0x14   : > { %2278 = vmatmul.msk.f32.vlgmr.msra.gmra.mxu0 %vm252_vm0, %v220_v2  ;;  %2310 = vmatmul.msk.f32.vlgmr.msra.gmra.mxu1 %vm252_vm0, %v220_v2  ;;  %v238_v30 = vld [vmem:[%s3906_s1 + $0x90] sm:$0xff]  ;;  %v240_v40 = vld [vmem:[%s3906_s1 + $0xa0] sm:$0xff]  ;;  %v241_v45 = vld [vmem:[%s3906_s1 + $0xa8] sm:$0xff] }
  0x15   : > { %703 = vmatpush.msra.mxu3 %v219_v3  ;;  %590 = vmatpush.msra.mxu2 %v218_v4  ;;  %v242_v50 = vld [vmem:[%s3906_s1 + $0xb0] sm:$0xff]  ;;  %v243_v55 = vld [vmem:[%s3906_s1 + $0xb8] sm:$0xff]  ;;  %v244_v60 = vld [vmem:[%s3906_s1 + $0xc0] sm:$0xff] }
  0x16   : > { %2374 = vmatmul.msk.f32.vlgmr.msra.gmra.mxu3 %vm252_vm0, %v220_v2  ;;  %2342 = vmatmul.msk.f32.vlgmr.msra.gmra.mxu2 %vm252_vm0, %v220_v2  ;;  %v245_v1 = vld [vmem:[%s3906_s1 + $0xc8] sm:$0xff] }
  0x1c   : > { %2279 = vmatmul.msk.f32.gmra.mxu0 %vm252_vm0, %v221_v5  ;;  %2311 = vmatmul.msk.f32.gmra.mxu1 %vm252_vm0, %v221_v5 }
  0x1e   : > { %2375 = vmatmul.msk.f32.gmra.mxu3 %vm252_vm0, %v221_v5  ;;  %2343 = vmatmul.msk.f32.gmra.mxu2 %vm252_vm0, %v221_v5 }
  0x24   : > { %2280 = vmatmul.msk.f32.gmra.mxu0 %vm252_vm0, %v222_v6  ;;  %2312 = vmatmul.msk.f32.gmra.mxu1 %vm252_vm0, %v222_v6 }
  0x26   : > { %2376 = vmatmul.msk.f32.gmra.mxu3 %vm252_vm0, %v222_v6  ;;  %2344 = vmatmul.msk.f32.gmra.mxu2 %vm252_vm0, %v222_v6  ;;  %v246_v6 = vld [vmem:[%s3906_s1 + $0xd0] sm:$0xff] }
  0x2c   : > { %2281 = vmatmul.msk.f32.gmra.mxu0 %vm252_vm0, %v223_v7  ;;  %2313 = vmatmul.msk.f32.gmra.mxu1 %vm252_vm0, %v223_v7 }
  0x2e   : > { %2377 = vmatmul.msk.f32.gmra.mxu3 %vm252_vm0, %v223_v7  ;;  %2345 = vmatmul.msk.f32.gmra.mxu2 %vm252_vm0, %v223_v7 }
  0x34   : > { %2282 = vmatmul.msk.f32.gmra.mxu0 %vm252_vm0, %v224_v8  ;;  %2314 = vmatmul.msk.f32.gmra.mxu1 %vm252_vm0, %v224_v8 }
  0x36   : > { %2378 = vmatmul.msk.f32.gmra.mxu3 %vm252_vm0, %v224_v8  ;;  %2346 = vmatmul.msk.f32.gmra.mxu2 %vm252_vm0, %v224_v8 }
  0x3c   : > { %2283 = vmatmul.msk.f32.gmra.mxu0 %vm252_vm0, %v225_v9  ;;  %2315 = vmatmul.msk.f32.gmra.mxu1 %vm252_vm0, %v225_v9 }
  0x3e   : > { %2379 = vmatmul.msk.f32.gmra.mxu3 %vm252_vm0, %v225_v9  ;;  %2347 = vmatmul.msk.f32.gmra.mxu2 %vm252_vm0, %v225_v9 }
  0x44   : > { %2284 = vmatmul.msk.f32.gmra.mxu0 %vm252_vm0, %v226_v10  ;;  %2316 = vmatmul.msk.f32.gmra.mxu1 %vm252_vm0, %v226_v10 }
  0x46   : > { %2380 = vmatmul.msk.f32.gmra.mxu3 %vm252_vm0, %v226_v10  ;;  %2348 = vmatmul.msk.f32.gmra.mxu2 %vm252_vm0, %v226_v10 }
  0x4c   : > { %2285 = vmatmul.msk.f32.gmra.mxu0 %vm252_vm0, %v227_v11  ;;  %2317 = vmatmul.msk.f32.gmra.mxu1 %vm252_vm0, %v227_v11 }
  0x4e   : > { %2381 = vmatmul.msk.f32.gmra.mxu3 %vm252_vm0, %v227_v11  ;;  %2349 = vmatmul.msk.f32.gmra.mxu2 %vm252_vm0, %v227_v11  ;;  %v247_v11 = vld [vmem:[%s3906_s1 + $0xd8] sm:$0xff] }
  0x54   : > { %2286 = vmatmul.msk.f32.gmra.mxu0 %vm252_vm0, %v228_v12  ;;  %2318 = vmatmul.msk.f32.gmra.mxu1 %vm252_vm0, %v228_v12 }
  0x56   : > { %2382 = vmatmul.msk.f32.gmra.mxu3 %vm252_vm0, %v228_v12  ;;  %2350 = vmatmul.msk.f32.gmra.mxu2 %vm252_vm0, %v228_v12 }
  0x5c   : > { %2287 = vmatmul.msk.f32.gmra.mxu0 %vm252_vm0, %v229_v13  ;;  %2319 = vmatmul.msk.f32.gmra.mxu1 %vm252_vm0, %v229_v13 }
  0x5e   : > { %2383 = vmatmul.msk.f32.gmra.mxu3 %vm252_vm0, %v229_v13  ;;  %2351 = vmatmul.msk.f32.gmra.mxu2 %vm252_vm0, %v229_v13 }
  0x64   : > { %2288 = vmatmul.msk.f32.gmra.mxu0 %vm252_vm0, %v230_v14  ;;  %2320 = vmatmul.msk.f32.gmra.mxu1 %vm252_vm0, %v230_v14 }
  0x66   : > { %2384 = vmatmul.msk.f32.gmra.mxu3 %vm252_vm0, %v230_v14  ;;  %2352 = vmatmul.msk.f32.gmra.mxu2 %vm252_vm0, %v230_v14 }
  0x6c   : > { %2289 = vmatmul.msk.f32.gmra.mxu0 %vm252_vm0, %v231_v15  ;;  %2321 = vmatmul.msk.f32.gmra.mxu1 %vm252_vm0, %v231_v15 }
  0x6e   : > { %2385 = vmatmul.msk.f32.gmra.mxu3 %vm252_vm0, %v231_v15  ;;  %2353 = vmatmul.msk.f32.gmra.mxu2 %vm252_vm0, %v231_v15 }
  0x74   : > { %2290 = vmatmul.msk.f32.gmra.mxu0 %vm252_vm0, %v232_v16  ;;  %2322 = vmatmul.msk.f32.gmra.mxu1 %vm252_vm0, %v232_v16 }
  0x76   : > { %2386 = vmatmul.msk.f32.gmra.mxu3 %vm252_vm0, %v232_v16  ;;  %2354 = vmatmul.msk.f32.gmra.mxu2 %vm252_vm0, %v232_v16  ;;  %v248_v16 = vld [vmem:[%s3906_s1 + $0xe0] sm:$0xff] }
  0x7c   : > { %2291 = vmatmul.msk.f32.gmra.mxu0 %vm252_vm0, %v233_v17  ;;  %2323 = vmatmul.msk.f32.gmra.mxu1 %vm252_vm0, %v233_v17 }
  0x7e   : > { %2387 = vmatmul.msk.f32.gmra.mxu3 %vm252_vm0, %v233_v17  ;;  %2355 = vmatmul.msk.f32.gmra.mxu2 %vm252_vm0, %v233_v17 }
  0x84   : > { %2292 = vmatmul.msk.f32.gmra.mxu0 %vm252_vm0, %v234_v18  ;;  %2324 = vmatmul.msk.f32.gmra.mxu1 %vm252_vm0, %v234_v18 }
  0x86   : > { %2388 = vmatmul.msk.f32.gmra.mxu3 %vm252_vm0, %v234_v18  ;;  %2356 = vmatmul.msk.f32.gmra.mxu2 %vm252_vm0, %v234_v18 }
  0x8c   : > { %2293 = vmatmul.msk.f32.gmra.mxu0 %vm252_vm0, %v235_v19  ;;  %2325 = vmatmul.msk.f32.gmra.mxu1 %vm252_vm0, %v235_v19 }
  0x8e   : > { %2389 = vmatmul.msk.f32.gmra.mxu3 %vm252_vm0, %v235_v19  ;;  %2357 = vmatmul.msk.f32.gmra.mxu2 %vm252_vm0, %v235_v19 }
  0x91   : > { %v2628_v20 = vpop.f32.mrf.mxu0  ;;  %v2630_v21 = vpop.f32.mrf.mxu1 }
  0x94   : > { %2294 = vmatmul.msk.f32.gmra.mxu0 %vm252_vm0, %v236_v22  ;;  %2326 = vmatmul.msk.f32.gmra.mxu1 %vm252_vm0, %v236_v22 }
  0x96   : > { %2390 = vmatmul.msk.f32.gmra.mxu3 %vm252_vm0, %v236_v22  ;;  %2358 = vmatmul.msk.f32.gmra.mxu2 %vm252_vm0, %v236_v22 }
  0x99   : > { %v2639_v23 = vpop.f32.mrf.mxu0  ;;  %v2641_v24 = vpop.f32.mrf.mxu1 }
  0x9a   : > { %v2646_v26 = vpop.f32.mrf.mxu3  ;;  %v2648_v27 = vpop.f32.mrf.mxu2 }
  0x9b   : > { %4022 = vst [vmem:[#allocation5_spill] sm:$0xff] %v2646_v26 }
  0x9c   : > { %4023 = vst [vmem:[#allocation6_spill] sm:$0xff] %v2648_v27  ;;  %2295 = vmatmul.msk.f32.gmra.mxu0 %vm252_vm0, %v237_v25  ;;  %2327 = vmatmul.msk.f32.gmra.mxu1 %vm252_vm0, %v237_v25 }
  0x9e   : > { %2391 = vmatmul.msk.f32.gmra.mxu3 %vm252_vm0, %v237_v25  ;;  %2359 = vmatmul.msk.f32.gmra.mxu2 %vm252_vm0, %v237_v25  ;;  %v249_v25 = vld [vmem:[%s3906_s1 + $0xe8] sm:$0xff] }
  0xa1   : > { %v2654_v28 = vpop.f32.mrf.mxu0  ;;  %v2656_v29 = vpop.f32.mrf.mxu1 }
  0xa2   : > { %v2661_v31 = vpop.f32.mrf.mxu3  ;;  %v2663_v32 = vpop.f32.mrf.mxu2 }
  0xa3   : > { %4024 = vst [vmem:[#allocation7_spill] sm:$0xff] %v2661_v31 }
  0xa4   : > { %4025 = vst [vmem:[#allocation8_spill] sm:$0xff] %v2663_v32  ;;  %2296 = vmatmul.msk.f32.gmra.mxu0 %vm252_vm0, %v238_v30  ;;  %2328 = vmatmul.msk.f32.gmra.mxu1 %vm252_vm0, %v238_v30 }
  0xa6   : > { %2392 = vmatmul.msk.f32.gmra.mxu3 %vm252_vm0, %v238_v30  ;;  %2360 = vmatmul.msk.f32.gmra.mxu2 %vm252_vm0, %v238_v30 }
  0xa9   : > { %v2669_v33 = vpop.f32.mrf.mxu0  ;;  %v2671_v34 = vpop.f32.mrf.mxu1 }
  0xaa   : > { %v2676_v36 = vpop.f32.mrf.mxu3  ;;  %v2678_v37 = vpop.f32.mrf.mxu2 }
  0xab   : > { %4026 = vst [vmem:[#allocation9_spill] sm:$0xff] %v2676_v36 }
  0xac   : > { %4027 = vst [vmem:[#allocation10_spill] sm:$0xff] %v2678_v37  ;;  %2297 = vmatmul.msk.f32.gmra.mxu0 %vm252_vm0, %v239_v35  ;;  %2329 = vmatmul.msk.f32.gmra.mxu1 %vm252_vm0, %v239_v35 }
  0xae   : > { %2393 = vmatmul.msk.f32.gmra.mxu3 %vm252_vm0, %v239_v35  ;;  %2361 = vmatmul.msk.f32.gmra.mxu2 %vm252_vm0, %v239_v35 }
  0xb1   : > { %v2684_v38 = vpop.f32.mrf.mxu0  ;;  %v2686_v39 = vpop.f32.mrf.mxu1 }
  0xb2   : > { %v2691_v41 = vpop.f32.mrf.mxu3  ;;  %v2693_v42 = vpop.f32.mrf.mxu2 }
  0xb3   : > { %4028 = vst [vmem:[#allocation11_spill] sm:$0xff] %v2693_v42 }
  0xb4   : > { %2298 = vmatmul.msk.f32.gmra.mxu0 %vm252_vm0, %v240_v40  ;;  %2330 = vmatmul.msk.f32.gmra.mxu1 %vm252_vm0, %v240_v40 }
  0xb6   : > { %2394 = vmatmul.msk.f32.gmra.mxu3 %vm252_vm0, %v240_v40  ;;  %2362 = vmatmul.msk.f32.gmra.mxu2 %vm252_vm0, %v240_v40 }
  0xb9   : > { %v2699_v43 = vpop.f32.mrf.mxu0  ;;  %v2701_v44 = vpop.f32.mrf.mxu1 }
  0xba   : > { %v2706_v46 = vpop.f32.mrf.mxu3  ;;  %v2708_v47 = vpop.f32.mrf.mxu2 }
  0xbc   : > { %2299 = vmatmul.msk.f32.gmra.mxu0 %vm252_vm0, %v241_v45  ;;  %2331 = vmatmul.msk.f32.gmra.mxu1 %vm252_vm0, %v241_v45 }
  0xbe   : > { %2395 = vmatmul.msk.f32.gmra.mxu3 %vm252_vm0, %v241_v45  ;;  %2363 = vmatmul.msk.f32.gmra.mxu2 %vm252_vm0, %v241_v45 }
  0xc1   : > { %v2714_v48 = vpop.f32.mrf.mxu0  ;;  %v2716_v49 = vpop.f32.mrf.mxu1 }
  0xc2   : > { %v2721_v51 = vpop.f32.mrf.mxu3  ;;  %v2723_v52 = vpop.f32.mrf.mxu2 }
  0xc4   : > { %2300 = vmatmul.msk.f32.gmra.mxu0 %vm252_vm0, %v242_v50  ;;  %2332 = vmatmul.msk.f32.gmra.mxu1 %vm252_vm0, %v242_v50 }
  0xc6   : > { %2396 = vmatmul.msk.f32.gmra.mxu3 %vm252_vm0, %v242_v50  ;;  %2364 = vmatmul.msk.f32.gmra.mxu2 %vm252_vm0, %v242_v50  ;;  %v250_v50 = vld [vmem:[%s3906_s1 + $0xf0] sm:$0xff] }
  0xc9   : > { %v2729_v53 = vpop.f32.mrf.mxu0  ;;  %v2731_v54 = vpop.f32.mrf.mxu1 }
  0xca   : > { %v2736_v56 = vpop.f32.mrf.mxu3  ;;  %v2738_v57 = vpop.f32.mrf.mxu2 }
  0xcc   : > { %2301 = vmatmul.msk.f32.gmra.mxu0 %vm252_vm0, %v243_v55  ;;  %2333 = vmatmul.msk.f32.gmra.mxu1 %vm252_vm0, %v243_v55 }
  0xce   : > { %2397 = vmatmul.msk.f32.gmra.mxu3 %vm252_vm0, %v243_v55  ;;  %2365 = vmatmul.msk.f32.gmra.mxu2 %vm252_vm0, %v243_v55 }
  0xd1   : > { %v2744_v58 = vpop.f32.mrf.mxu0  ;;  %v2746_v59 = vpop.f32.mrf.mxu1 }
  0xd2   : > { %v2751_v61 = vpop.f32.mrf.mxu3  ;;  %v2753_v62 = vpop.f32.mrf.mxu2 }
  0xd4   : > { %2302 = vmatmul.msk.f32.gmra.mxu0 %vm252_vm0, %v244_v60  ;;  %2334 = vmatmul.msk.f32.gmra.mxu1 %vm252_vm0, %v244_v60 }
  0xd6   : > { %2398 = vmatmul.msk.f32.gmra.mxu3 %vm252_vm0, %v244_v60  ;;  %2366 = vmatmul.msk.f32.gmra.mxu2 %vm252_vm0, %v244_v60 }
  0xd9   : > { %v2759_v63 = vpop.f32.mrf.mxu0  ;;  %v2761_v0 = vpop.f32.mrf.mxu1 }
  0xda   : > { %v2766_v2 = vpop.f32.mrf.mxu3  ;;  %v2768_v3 = vpop.f32.mrf.mxu2 }
  0xdc   : > { %2303 = vmatmul.msk.f32.gmra.mxu0 %vm252_vm0, %v245_v1  ;;  %2335 = vmatmul.msk.f32.gmra.mxu1 %vm252_vm0, %v245_v1 }
  0xde   : > { %2399 = vmatmul.msk.f32.gmra.mxu3 %vm252_vm0, %v245_v1  ;;  %2367 = vmatmul.msk.f32.gmra.mxu2 %vm252_vm0, %v245_v1 }
  0xe1   : > { %v2774_v4 = vpop.f32.mrf.mxu0  ;;  %v2776_v5 = vpop.f32.mrf.mxu1 }
  0xe2   : > { %v2781_v7 = vpop.f32.mrf.mxu3  ;;  %v2783_v8 = vpop.f32.mrf.mxu2 }
  0xe4   : > { %2304 = vmatmul.msk.f32.gmra.mxu0 %vm252_vm0, %v246_v6  ;;  %2336 = vmatmul.msk.f32.gmra.mxu1 %vm252_vm0, %v246_v6 }
  0xe6   : > { %2400 = vmatmul.msk.f32.gmra.mxu3 %vm252_vm0, %v246_v6  ;;  %2368 = vmatmul.msk.f32.gmra.mxu2 %vm252_vm0, %v246_v6 }
  0xe9   : > { %v2789_v9 = vpop.f32.mrf.mxu0  ;;  %v2791_v10 = vpop.f32.mrf.mxu1 }
  0xea   : > { %v2796_v12 = vpop.f32.mrf.mxu3  ;;  %v2798_v13 = vpop.f32.mrf.mxu2 }
  0xec   : > { %2305 = vmatmul.msk.f32.gmra.mxu0 %vm252_vm0, %v247_v11  ;;  %2337 = vmatmul.msk.f32.gmra.mxu1 %vm252_vm0, %v247_v11 }
  0xee   : > { %2401 = vmatmul.msk.f32.gmra.mxu3 %vm252_vm0, %v247_v11  ;;  %2369 = vmatmul.msk.f32.gmra.mxu2 %vm252_vm0, %v247_v11  ;;  %v251_v11 = vld [vmem:[%s3906_s1 + $0xf8] sm:$0xff] }
  0xf1   : > { %v402_v14 = vpop.f32.mrf.mxu0  ;;  %v515_v15 = vpop.f32.mrf.mxu1 }
  0xf2   : > { %v2807_v17 = vpop.f32.mrf.mxu3  ;;  %v2809_v18 = vpop.f32.mrf.mxu2  ;;  %v850_v36 = vmax.f32 %v515_v15, 0.0  ;;  %v838_v15 = vmax.f32 %v2761_v0, 0.0  ;;  %v830_v0 = vmax.f32 %v2731_v54, 0.0  ;;  %v818_v54 = vmax.f32 %v2686_v39, 0.0 }
  0xf3   : > { %v806_v39 = vmax.f32 %v2641_v24, 0.0 }
  0xf4   : > { %2306 = vmatmul.msk.f32.gmra.mxu0 %vm252_vm0, %v248_v16  ;;  %2338 = vmatmul.msk.f32.gmra.mxu1 %vm252_vm0, %v248_v16 }
  0xf6   : > { %2402 = vmatmul.msk.f32.gmra.mxu3 %vm252_vm0, %v248_v16  ;;  %2370 = vmatmul.msk.f32.gmra.mxu2 %vm252_vm0, %v248_v16 }
  0xf9   : > { %v405_v19 = vpop.f32.mrf.mxu0  ;;  %v518_v22 = vpop.f32.mrf.mxu1 }
  0xfa   : > { %v2818_v30 = vpop.f32.mrf.mxu3  ;;  %v2820_v35 = vpop.f32.mrf.mxu2  ;;  %v853_v31 = vmax.f32 %v405_v19, 0.0  ;;  %v854_v37 = vmax.f32 %v518_v22, 0.0  ;;  %v846_v19 = vmax.f32 %v2791_v10, 0.0  ;;  %v834_v10 = vmax.f32 %v2746_v59, 0.0 }
  0xfb   : > { %v822_v59 = vmax.f32 %v2701_v44, 0.0  ;;  %v814_v44 = vmax.f32 %v2671_v34, 0.0 }
  0xfc   : > { %2307 = vmatmul.msk.f32.gmra.mxu0 %vm252_vm0, %v249_v25  ;;  %2339 = vmatmul.msk.f32.gmra.mxu1 %vm252_vm0, %v249_v25 }
  0xfe   : > { %2403 = vmatmul.msk.f32.gmra.mxu3 %vm252_vm0, %v249_v25  ;;  %2371 = vmatmul.msk.f32.gmra.mxu2 %vm252_vm0, %v249_v25 }
 0x101   : > { %v408_v40 = vpop.f32.mrf.mxu0  ;;  %v521_v45 = vpop.f32.mrf.mxu1 }
 0x102   : > { %v2829_v55 = vpop.f32.mrf.mxu3  ;;  %v2831_v60 = vpop.f32.mrf.mxu2  ;;  %v857_v32 = vmax.f32 %v408_v40, 0.0 }
 0x104   : > { %2308 = vmatmul.msk.f32.gmra.mxu0 %vm252_vm0, %v250_v50  ;;  %2340 = vmatmul.msk.f32.gmra.mxu1 %vm252_vm0, %v250_v50 }
 0x106   : > { %2404 = vmatmul.msk.f32.gmra.mxu3 %vm252_vm0, %v250_v50  ;;  %2372 = vmatmul.msk.f32.gmra.mxu2 %vm252_vm0, %v250_v50  ;;  %v858_v50 = vmax.f32 %v521_v45, 0.0 }
 0x109   : > { %v411_v1 = vpop.f32.mrf.mxu0  ;;  %v524_v6 = vpop.f32.mrf.mxu1 }
 0x10a   : > { %v861_v16 = vmax.f32 %v411_v1, 0.0  ;;  %v862_v25 = vmax.f32 %v524_v6, 0.0  ;;  %v2840_v27 = vpop.f32.mrf.mxu3  ;;  %v2842_v26 = vpop.f32.mrf.mxu2  ;;  %v849_v6 = vmax.f32 %v402_v14, 0.0  ;;  %v837_v14 = vmax.f32 %v2759_v63, 0.0 }
 0x10b   : > { %v829_v63 = vmax.f32 %v2729_v53, 0.0  ;;  %v817_v53 = vmax.f32 %v2684_v38, 0.0  ;;  %v805_v38 = vmax.f32 %v2639_v23, 0.0  ;;  %v859_v23 = vmax.f32 %v2842_v26, 0.0 }
 0x10c   : > { %2309 = vmatmul.msk.f32.gmra.mxu0 %vm252_vm0, %v251_v11  ;;  %2341 = vmatmul.msk.f32.gmra.mxu1 %vm252_vm0, %v251_v11  ;;  %v848_v26 = vmax.f32 %v2807_v17, 0.0  ;;  %v840_v17 = vmax.f32 %v2781_v7, 0.0  ;;  %v828_v7 = vmax.f32 %v2736_v56, 0.0  ;;  %v816_v56 = vmax.f32 %v2691_v41, 0.0  ;;  %v4036_v41 = vld [vmem:[#allocation7_spill] sm:$0xff] }
 0x10d   : > { %993 = vmatpush.msrb.mxu0 %v861_v16  ;;  %1219 = vmatpush.msrb.mxu2 %v862_v25 }
 0x10e   : > { %2405 = vmatmul.msk.f32.gmra.mxu3 %vm252_vm0, %v251_v11  ;;  %2373 = vmatmul.msk.f32.gmra.mxu2 %vm252_vm0, %v251_v11  ;;  %v826_v11 = vmax.f32 %v2716_v49, 0.0  ;;  %v809_v49 = vmax.f32 %v2654_v28, 0.0  ;;  %v801_v28 = vmax.f32 %v2628_v20, 0.0  ;;  %v852_v20 = vmax.f32 %v2818_v30, 0.0 }
 0x10f   : > { %994 = vmatpush.msrb.mxu0 %v857_v32  ;;  %1220 = vmatpush.msrb.mxu2 %v858_v50  ;;  %v845_v32 = vmax.f32 %v2789_v9, 0.0  ;;  %v833_v9 = vmax.f32 %v2744_v58, 0.0  ;;  %v821_v58 = vmax.f32 %v2699_v43, 0.0  ;;  %v813_v43 = vmax.f32 %v2669_v33, 0.0 }
 0x111   : > { %995 = vmatpush.msrb.mxu0 %v853_v31  ;;  %1221 = vmatpush.msrb.mxu2 %v854_v37  ;;  %v2848_v1 = vpop.f32.mrf.mxu0  ;;  %v2850_v40 = vpop.f32.mrf.mxu1  ;;  %v841_v31 = vmax.f32 %v2774_v4, 0.0  ;;  %v842_v37 = vmax.f32 %v2776_v5, 0.0  ;;  %v825_v5 = vmax.f32 %v2714_v48, 0.0 }
 0x112   : > { %v2852_v42 = vpop.f32.mrf.mxu3  ;;  %v2854_v16 = vpop.f32.mrf.mxu2 }
 0x113   : > { %996 = vmatpush.msrb.mxu0 %v849_v6  ;;  %1222 = vmatpush.msrb.mxu2 %v850_v36 }
 0x115   : > { %997 = vmatpush.msrb.mxu0 %v845_v32  ;;  %1223 = vmatpush.msrb.mxu2 %v846_v19  ;;  %v810_v32 = vmax.f32 %v2656_v29, 0.0  ;;  %v864_v19 = vmax.f32 %v2852_v42, 0.0  ;;  %v802_v29 = vmax.f32 %v2630_v21, 0.0  ;;  %v856_v42 = vmax.f32 %v2829_v55, 0.0 }
 0x116   : > { %v851_v21 = vmax.f32 %v2820_v35, 0.0  ;;  %v844_v55 = vmax.f32 %v2796_v12, 0.0  ;;  %v832_v12 = vmax.f32 %v2751_v61, 0.0  ;;  %v824_v61 = vmax.f32 %v2721_v51, 0.0 }
 0x117   : > { %998 = vmatpush.msrb.mxu0 %v841_v31  ;;  %1224 = vmatpush.msrb.mxu2 %v842_v37  ;;  %v863_v31 = vmax.f32 %v2854_v16, 0.0  ;;  %v860_v37 = vmax.f32 %v2840_v27, 0.0  ;;  %v855_v16 = vmax.f32 %v2831_v60, 0.0  ;;  %v847_v27 = vmax.f32 %v2809_v18, 0.0 }
 0x118   : > { %v843_v60 = vmax.f32 %v2798_v13, 0.0  ;;  %v839_v18 = vmax.f32 %v2783_v8, 0.0  ;;  %v831_v13 = vmax.f32 %v2753_v62, 0.0  ;;  %v827_v8 = vmax.f32 %v2738_v57, 0.0  ;;  %v4033_v57 = vld [vmem:[#allocation11_spill] sm:$0xff] }
 0x119   : > { %999 = vmatpush.msrb.mxu0 %v837_v14  ;;  %1225 = vmatpush.msrb.mxu2 %v838_v15  ;;  %v2862_v22 = vpop.f32.mrf.mxu0  ;;  %v2864_v36 = vpop.f32.mrf.mxu1  ;;  %v823_v62 = vmax.f32 %v2723_v52, 0.0 }
 0x11a   : > { %v2868_v45 = vpop.f32.mrf.mxu3  ;;  %v2870_v4 = vpop.f32.mrf.mxu2 }
 0x11b   : > { %4029 = vst [vmem:[#allocation12_spill] sm:$0xff] %v2868_v45  ;;  %1000 = vmatpush.msrb.mxu0 %v833_v9  ;;  %1226 = vmatpush.msrb.mxu2 %v834_v10  ;;  %v836_v10 = vmax.f32 %v2766_v2, 0.0 }
 0x11c   : > { %4030 = vst [vmem:[#allocation13_spill] sm:$0xff] %v2870_v4 }
 0x11d   : > { %1001 = vmatpush.msrb.mxu0 %v829_v63  ;;  %1227 = vmatpush.msrb.mxu2 %v830_v0  ;;  %v835_v63 = vmax.f32 %v2768_v3, 0.0 }
 0x11f   : > { %1002 = vmatpush.msrb.mxu0 %v825_v5  ;;  %1228 = vmatpush.msrb.mxu2 %v826_v11  ;;  %v820_v11 = vmax.f32 %v2706_v46, 0.0  ;;  %v4034_v46 = vld [vmem:[#allocation9_spill] sm:$0xff] }
 0x121   : > { %1003 = vmatpush.msrb.mxu0 %v821_v58  ;;  %1229 = vmatpush.msrb.mxu2 %v822_v59  ;;  %v2878_v25 = vpop.f32.mrf.mxu0  ;;  %v2880_v50 = vpop.f32.mrf.mxu1  ;;  %v819_v58 = vmax.f32 %v2708_v47, 0.0  ;;  %v815_v59 = vmax.f32 %v4033_v57, 0.0  ;;  %v812_v47 = vmax.f32 %v4034_v46, 0.0 }
 0x122   : > { %v2884_v6 = vpop.f32.mrf.mxu3  ;;  %v2886_v48 = vpop.f32.mrf.mxu2 }
 0x123   : > { %4031 = vst [vmem:[#allocation14_spill] sm:$0xff] %v2884_v6  ;;  %1004 = vmatpush.msrb.mxu0 %v817_v53  ;;  %1230 = vmatpush.msrb.mxu2 %v818_v54 }
 0x124   : > { %4032 = vst [vmem:[#allocation15_spill] sm:$0xff] %v2886_v48 }
 0x125   : > { %1005 = vmatpush.msrb.mxu0 %v813_v43  ;;  %1231 = vmatpush.msrb.mxu2 %v814_v44  ;;  %v4035_v43 = vld [vmem:[#allocation10_spill] sm:$0xff] }
 0x126   : > { %v811_v44 = vmax.f32 %v4035_v43, 0.0 }
 0x127   : > { %1006 = vmatpush.msrb.mxu0 %v809_v49  ;;  %1232 = vmatpush.msrb.mxu2 %v810_v32  ;;  %v808_v49 = vmax.f32 %v4036_v41, 0.0  ;;  %v4037_v32 = vld [vmem:[#allocation8_spill] sm:$0xff] }
 0x129   : > { %1007 = vmatpush.msrb.mxu0 %v805_v38  ;;  %1233 = vmatpush.msrb.mxu2 %v806_v39  ;;  %v2896_v33 = vpop.f32.mrf.mxu0  ;;  %v2898_v34 = vpop.f32.mrf.mxu1  ;;  %v807_v38 = vmax.f32 %v4037_v32, 0.0  ;;  %v4038_v39 = vld [vmem:[#allocation5_spill] sm:$0xff] }
 0x12a   : > { %v2904_v14 = vpop.f32.mrf.mxu3  ;;  %v2906_v24 = vpop.f32.mrf.mxu2 }
 0x12b   : > { %1008 = vmatpush.msrb.mxu0 %v801_v28  ;;  %1234 = vmatpush.msrb.mxu2 %v802_v29 }
 0x12d   : > { %1671 = vmatpush.msra.mxu2 %v864_v19  ;;  %1445 = vmatpush.msra.mxu0 %v863_v31  ;;  %v804_v19 = vmax.f32 %v4038_v39, 0.0  ;;  %v4039_v31 = vld [vmem:[#allocation6_spill] sm:$0xff] }
 0x12e   : > { %v803_v28 = vmax.f32 %v4039_v31, 0.0 }
 0x12f   : > { %1672 = vmatpush.msra.mxu2 %v860_v37  ;;  %1446 = vmatpush.msra.mxu0 %v859_v23 }
 0x131   : > { %1673 = vmatpush.msra.mxu2 %v856_v42  ;;  %1447 = vmatpush.msra.mxu0 %v855_v16  ;;  %v2914_v15 = vpop.f32.mrf.mxu0  ;;  %v2916_v9 = vpop.f32.mrf.mxu1 }
 0x132   : > { %v2920_v30 = vpop.f32.mrf.mxu3  ;;  %v2922_v35 = vpop.f32.mrf.mxu2 }
 0x133   : > { %1674 = vmatpush.msra.mxu2 %v852_v20  ;;  %1448 = vmatpush.msra.mxu0 %v851_v21 }
 0x135   : > { %1675 = vmatpush.msra.mxu2 %v848_v26  ;;  %1449 = vmatpush.msra.mxu0 %v847_v27 }
 0x137   : > { %1676 = vmatpush.msra.mxu2 %v844_v55  ;;  %1450 = vmatpush.msra.mxu0 %v843_v60 }
 0x139   : > { %1677 = vmatpush.msra.mxu2 %v840_v17  ;;  %1451 = vmatpush.msra.mxu0 %v839_v18  ;;  %v2930_v0 = vpop.f32.mrf.mxu0  ;;  %v2932_v5 = vpop.f32.mrf.mxu1 }
 0x13a   : > { %v2936_v2 = vpop.f32.mrf.mxu3  ;;  %v2938_v3 = vpop.f32.mrf.mxu2 }
 0x13b   : > { %1678 = vmatpush.msra.mxu2 %v836_v10  ;;  %1452 = vmatpush.msra.mxu0 %v835_v63 }
 0x13d   : > { %1679 = vmatpush.msra.mxu2 %v832_v12  ;;  %1453 = vmatpush.msra.mxu0 %v831_v13 }
 0x13f   : > { %1680 = vmatpush.msra.mxu2 %v828_v7  ;;  %1454 = vmatpush.msra.mxu0 %v827_v8 }
 0x141   : > { %1681 = vmatpush.msra.mxu2 %v824_v61  ;;  %1455 = vmatpush.msra.mxu0 %v823_v62  ;;  %v2946_v53 = vpop.f32.mrf.mxu0  ;;  %v2948_v54 = vpop.f32.mrf.mxu1 }
 0x142   : > { %v2950_v51 = vpop.f32.mrf.mxu3  ;;  %v2952_v52 = vpop.f32.mrf.mxu2 }
 0x143   : > { %1682 = vmatpush.msra.mxu2 %v820_v11  ;;  %1456 = vmatpush.msra.mxu0 %v819_v58 }
 0x145   : > { %1683 = vmatpush.msra.mxu2 %v816_v56  ;;  %1457 = vmatpush.msra.mxu0 %v815_v59 }
 0x147   : > { %1684 = vmatpush.msra.mxu2 %v812_v47  ;;  %1458 = vmatpush.msra.mxu0 %v811_v44 }
 0x149   : > { %1685 = vmatpush.msra.mxu2 %v808_v49  ;;  %1459 = vmatpush.msra.mxu0 %v807_v38  ;;  %v2960_v29 = vpop.f32.mrf.mxu0  ;;  %v2962_v37 = vpop.f32.mrf.mxu1 }
 0x14a   : > { %v2964_v23 = vpop.f32.mrf.mxu3  ;;  %v2966_v42 = vpop.f32.mrf.mxu2 }
 0x14b   : > { %1686 = vmatpush.msra.mxu2 %v804_v19  ;;  %1460 = vmatpush.msra.mxu0 %v803_v28  ;;  %v2996_v19 = vld [vmem:[#allocation2] sm:$0xff] }
 0x14c   : > { %4040 = vst [vmem:[#allocation11_spill] sm:$0xff] %v2996_v19  ;;  %1235 = vmatmul.f32.vlgmr.msrb.gmra.mxu2 %v2996_v19  ;;  %1009 = vmatmul.f32.vlgmr.msrb.gmra.mxu0 %v2996_v19  ;;  %v3004_v19 = vld [vmem:[#allocation2 + $0x10] sm:$0xff] }
 0x151   : > { %v2968_v16 = vpop.f32.mrf.mxu0  ;;  %v2970_v20 = vpop.f32.mrf.mxu1 }
 0x152   : > { %v2972_v21 = vpop.f32.mrf.mxu3  ;;  %v2974_v26 = vpop.f32.mrf.mxu2 }
 0x154   : > { %1238 = vmatmul.f32.gmra.mxu2 %v3004_v19  ;;  %1012 = vmatmul.f32.gmra.mxu0 %v3004_v19 }
 0x159   : > { %v441_v27 = vpop.f32.mrf.mxu0  ;;  %v554_v55 = vpop.f32.mrf.mxu1 }
 0x15a   : > { %v2976_v60 = vpop.f32.mrf.mxu3  ;;  %v2978_v17 = vpop.f32.mrf.mxu2 }
 0x161   : > { %v444_v18 = vpop.f32.mrf.mxu0  ;;  %v557_v10 = vpop.f32.mrf.mxu1 }
 0x162   : > { %v2980_v63 = vpop.f32.mrf.mxu3  ;;  %v2982_v12 = vpop.f32.mrf.mxu2 }
 0x169   : > { %v447_v13 = vpop.f32.mrf.mxu0  ;;  %v560_v7 = vpop.f32.mrf.mxu1 }
 0x16a   : > { %v2984_v62 = vpop.f32.mrf.mxu3  ;;  %v2986_v11 = vpop.f32.mrf.mxu2  ;;  %v910_v6 = vmax.f32 %v560_v7, 0.0  ;;  %v894_v7 = vmax.f32 %v2962_v37, 0.0  ;;  %v886_v37 = vmax.f32 %v2932_v5, 0.0 }
 0x171   : > { %v450_v8 = vpop.f32.mrf.mxu0  ;;  %v563_v61 = vpop.f32.mrf.mxu1 }
 0x172   : > { %v2988_v57 = vpop.f32.mrf.mxu3  ;;  %v2990_v59 = vpop.f32.mrf.mxu2  ;;  %v913_v45 = vmax.f32 %v450_v8, 0.0  ;;  %v914_v48 = vmax.f32 %v563_v61, 0.0  ;;  %v901_v8 = vmax.f32 %v441_v27, 0.0  ;;  %v902_v61 = vmax.f32 %v554_v55, 0.0 }
 0x173   : > { %v881_v27 = vmax.f32 %v2914_v15, 0.0  ;;  %v882_v55 = vmax.f32 %v2916_v9, 0.0  ;;  %v874_v15 = vmax.f32 %v2880_v50, 0.0 }
 0x179   : > { %v453_v58 = vpop.f32.mrf.mxu0  ;;  %v566_v56 = vpop.f32.mrf.mxu1 }
 0x17a   : > { %v2992_v43 = vpop.f32.mrf.mxu3  ;;  %v2994_v44 = vpop.f32.mrf.mxu2  ;;  %v917_v28 = vmax.f32 %v453_v58, 0.0  ;;  %v918_v4 = vmax.f32 %v566_v56, 0.0  ;;  %v905_v58 = vmax.f32 %v444_v18, 0.0  ;;  %v3012_v56 = vld [vmem:[#allocation2 + $0x20] sm:$0xff] }
 0x17b   : > { %1241 = vmatmul.f32.gmra.mxu2 %v3012_v56  ;;  %1015 = vmatmul.f32.gmra.mxu0 %v3012_v56 }
 0x181   : > { %v456_v46 = vpop.f32.mrf.mxu0  ;;  %v569_v47 = vpop.f32.mrf.mxu1 }
 0x182   : > { %v921_v39 = vmax.f32 %v456_v46, 0.0  ;;  %v922_v31 = vmax.f32 %v569_v47, 0.0  ;;  %v3002_v46 = vpop.f32.mrf.mxu2  ;;  %v3024_v47 = vld [vmem:[#allocation2 + $0x30] sm:$0xff] }
 0x183   : > { %1244 = vmatmul.f32.gmra.mxu2 %v3024_v47  ;;  %1018 = vmatmul.f32.gmra.mxu0 %v3024_v47 }
 0x189   : > { %v459_v41 = vpop.f32.mrf.mxu0  ;;  %v572_v49 = vpop.f32.mrf.mxu1 }
 0x18a   : > { %v925_v32 = vmax.f32 %v459_v41, 0.0  ;;  %v926_v38 = vmax.f32 %v572_v49, 0.0  ;;  %v3000_v41 = vpop.f32.mrf.mxu3  ;;  %v909_v49 = vmax.f32 %v447_v13, 0.0  ;;  %v893_v13 = vmax.f32 %v2960_v29, 0.0  ;;  %v682_v18 = vpop.f32.mrf.mxu2 }
 0x18b   : > { %v885_v29 = vmax.f32 %v2930_v0, 0.0  ;;  %v873_v0 = vmax.f32 %v2878_v25, 0.0 }
 0x18c   : > { %1106 = vmatpush.msrb.mxu1 %v925_v32  ;;  %1332 = vmatpush.msrb.mxu3 %v926_v38  ;;  %v866_v32 = vmax.f32 %v2850_v40, 0.0  ;;  %v916_v40 = vmax.f32 %v2992_v43, 0.0  ;;  %v896_v43 = vmax.f32 %v2972_v21, 0.0  ;;  %v888_v21 = vmax.f32 %v2950_v51, 0.0  ;;  %v3080_v51 = vld [vmem:[#allocation2 + $0x38] sm:$0xff] }
 0x18d   : > { %4042 = vst [vmem:[#allocation10_spill] sm:$0xff] %v3080_v51 }
 0x18e   : > { %1107 = vmatpush.msrb.mxu1 %v921_v39  ;;  %1333 = vmatpush.msrb.mxu3 %v922_v31  ;;  %v3034_v39 = vld [vmem:[#allocation2 + $0x8] sm:$0xff]  ;;  %v923_v31 = vmax.f32 %v682_v18, 0.0  ;;  %v4047_v18 = vld [vmem:[#allocation13_spill] sm:$0xff] }
 0x190   : > { %1108 = vmatpush.msrb.mxu1 %v917_v28  ;;  %1334 = vmatpush.msrb.mxu3 %v918_v4  ;;  %v906_v4 = vmax.f32 %v557_v10, 0.0  ;;  %v877_v10 = vmax.f32 %v2896_v33, 0.0  ;;  %v869_v33 = vmax.f32 %v2862_v22, 0.0  ;;  %v3036_v28 = vld [vmem:[#allocation2 + $0x40] sm:$0xff]  ;;  %v920_v22 = vmax.f32 %v3000_v41, 0.0  ;;  %v3048_v41 = vld [vmem:[#allocation2 + $0x18] sm:$0xff] }
 0x191   : > { %1247 = vmatmul.f32.gmra.mxu2 %v3036_v28  ;;  %1021 = vmatmul.f32.gmra.mxu0 %v3036_v28 }
 0x192   : > { %1109 = vmatpush.msrb.mxu1 %v913_v45  ;;  %1335 = vmatpush.msrb.mxu3 %v914_v48  ;;  %v897_v45 = vmax.f32 %v2968_v16, 0.0  ;;  %v898_v48 = vmax.f32 %v2970_v20, 0.0  ;;  %v889_v16 = vmax.f32 %v2946_v53, 0.0  ;;  %v890_v20 = vmax.f32 %v2948_v54, 0.0  ;;  %v685_v9 = vpop.f32.mrf.mxu2 }
 0x193   : > { %v878_v53 = vmax.f32 %v2898_v34, 0.0  ;;  %v870_v34 = vmax.f32 %v2864_v36, 0.0  ;;  %v865_v54 = vmax.f32 %v2848_v1, 0.0  ;;  %v927_v25 = vmax.f32 %v685_v9, 0.0  ;;  %v3142_v9 = vld [vmem:[#allocation2 + $0xa8] sm:$0xff] }
 0x194   : > { %1110 = vmatpush.msrb.mxu1 %v909_v49  ;;  %1336 = vmatpush.msrb.mxu3 %v910_v6  ;;  %v795_v6 = vpop.f32.mrf.mxu3  ;;  %v919_v1 = vmax.f32 %v3002_v46, 0.0  ;;  %v915_v36 = vmax.f32 %v2994_v44, 0.0  ;;  %v912_v49 = vmax.f32 %v2988_v57, 0.0  ;;  %v908_v46 = vmax.f32 %v2984_v62, 0.0  ;;  %4060 = vst [vmem:[#allocation21_spill] sm:$0xff] %v3142_v9 }
 0x195   : > { %v924_v50 = vmax.f32 %v795_v6, 0.0  ;;  %v904_v57 = vmax.f32 %v2980_v63, 0.0  ;;  %v900_v62 = vmax.f32 %v2976_v60, 0.0  ;;  %v895_v44 = vmax.f32 %v2974_v26, 0.0  ;;  %v3064_v63 = vld [vmem:[#allocation2 + $0x28] sm:$0xff] }
 0x196   : > { %1111 = vmatpush.msrb.mxu1 %v905_v58  ;;  %1337 = vmatpush.msrb.mxu3 %v906_v4  ;;  %v911_v58 = vmax.f32 %v2990_v59, 0.0  ;;  %v907_v4 = vmax.f32 %v2986_v11, 0.0  ;;  %v903_v59 = vmax.f32 %v2982_v12, 0.0  ;;  %v899_v11 = vmax.f32 %v2978_v17, 0.0 }
 0x197   : > { %v892_v12 = vmax.f32 %v2964_v23, 0.0  ;;  %v887_v26 = vmax.f32 %v2952_v52, 0.0  ;;  %v884_v23 = vmax.f32 %v2936_v2, 0.0  ;;  %v880_v60 = vmax.f32 %v2920_v30, 0.0  ;;  %v3082_v52 = vld [vmem:[#allocation2 + $0x70] sm:$0xff]  ;;  %v4044_v30 = vld [vmem:[#allocation14_spill] sm:$0xff] }
 0x198   : > { %1112 = vmatpush.msrb.mxu1 %v901_v8  ;;  %1338 = vmatpush.msrb.mxu3 %v902_v61  ;;  %v3052_v8 = vld [vmem:[#allocation2 + $0x50] sm:$0xff]  ;;  %v891_v61 = vmax.f32 %v2966_v42, 0.0  ;;  %v883_v42 = vmax.f32 %v2938_v3, 0.0  ;;  %v879_v17 = vmax.f32 %v2922_v35, 0.0  ;;  %4043 = vst [vmem:[#allocation7_spill] sm:$0xff] %v3082_v52  ;;  %v876_v2 = vmax.f32 %v2904_v14, 0.0 }
 0x199   : > { %1250 = vmatmul.f32.gmra.mxu2 %v3052_v8  ;;  %1024 = vmatmul.f32.gmra.mxu0 %v3052_v8  ;;  %v875_v3 = vmax.f32 %v2906_v24, 0.0  ;;  %v872_v35 = vmax.f32 %v4044_v30, 0.0  ;;  %v3094_v14 = vld [vmem:[#allocation2 + $0x48] sm:$0xff]  ;;  %v3096_v24 = vld [vmem:[#allocation2 + $0x80] sm:$0xff] }
 0x19a   : > { %1113 = vmatpush.msrb.mxu1 %v897_v45  ;;  %1339 = vmatpush.msrb.mxu3 %v898_v48  ;;  %v3068_v45 = vld [vmem:[#allocation2 + $0x60] sm:$0xff]  ;;  %v4045_v48 = vld [vmem:[#allocation15_spill] sm:$0xff]  ;;  %4048 = vst [vmem:[#allocation8_spill] sm:$0xff] %v3094_v14  ;;  %v3226_v30 = vld [vmem:[#allocation2 + $0x128] sm:$0xff] }
 0x19b   : > { %4041 = vst [vmem:[#allocation9_spill] sm:$0xff] %v3068_v45 }
 0x19c   : > { %1114 = vmatpush.msrb.mxu1 %v893_v13  ;;  %1340 = vmatpush.msrb.mxu3 %v894_v7  ;;  %v798_v5 = vpop.f32.mrf.mxu3  ;;  %v871_v13 = vmax.f32 %v4045_v48, 0.0  ;;  %v4046_v7 = vld [vmem:[#allocation12_spill] sm:$0xff]  ;;  %4049 = vst [vmem:[#allocation5_spill] sm:$0xff] %v3096_v24 }
 0x19d   : > { %v928_v38 = vmax.f32 %v798_v5, 0.0  ;;  %v868_v6 = vmax.f32 %v4046_v7, 0.0  ;;  %v3136_v5 = vld [vmem:[#allocation2 + $0xd0] sm:$0xff]  ;;  %4080 = vst [vmem:[#allocation41_spill] sm:$0xff] %v3226_v30 }
 0x19e   : > { %1115 = vmatpush.msrb.mxu1 %v889_v16  ;;  %1341 = vmatpush.msrb.mxu3 %v890_v20  ;;  %v867_v16 = vmax.f32 %v4047_v18, 0.0  ;;  %v3102_v20 = vld [vmem:[#allocation2 + $0x58] sm:$0xff]  ;;  %4059 = vst [vmem:[#allocation20_spill] sm:$0xff] %v3136_v5 }
 0x19f   : > { %4050 = vst [vmem:[#allocation6_spill] sm:$0xff] %v3102_v20 }
 0x1a0   : > { %1116 = vmatpush.msrb.mxu1 %v885_v29  ;;  %1342 = vmatpush.msrb.mxu3 %v886_v37  ;;  %v3104_v29 = vld [vmem:[#allocation2 + $0x90] sm:$0xff]  ;;  %v3110_v37 = vld [vmem:[#allocation2 + $0x68] sm:$0xff] }
 0x1a1   : > { %1253 = vmatmul.f32.gmra.mxu2 %v3068_v45  ;;  %1027 = vmatmul.f32.gmra.mxu0 %v3068_v45  ;;  %4051 = vst [vmem:[#allocation14_spill] sm:$0xff] %v3104_v29 }
 0x1a2   : > { %1117 = vmatpush.msrb.mxu1 %v881_v27  ;;  %1343 = vmatpush.msrb.mxu3 %v882_v55  ;;  %4052 = vst [vmem:[#allocation15_spill] sm:$0xff] %v3110_v37  ;;  %v3112_v27 = vld [vmem:[#allocation2 + $0xa0] sm:$0xff]  ;;  %v3118_v55 = vld [vmem:[#allocation2 + $0x78] sm:$0xff] }
 0x1a3   : > { %4053 = vst [vmem:[#allocation12_spill] sm:$0xff] %v3112_v27 }
 0x1a4   : > { %1118 = vmatpush.msrb.mxu1 %v877_v10  ;;  %1344 = vmatpush.msrb.mxu3 %v878_v53  ;;  %4054 = vst [vmem:[#allocation13_spill] sm:$0xff] %v3118_v55  ;;  %v3120_v10 = vld [vmem:[#allocation2 + $0xb0] sm:$0xff]  ;;  %v3126_v53 = vld [vmem:[#allocation2 + $0x88] sm:$0xff] }
 0x1a5   : > { %4055 = vst [vmem:[#allocation16_spill] sm:$0xff] %v3120_v10 }
 0x1a6   : > { %1119 = vmatpush.msrb.mxu1 %v873_v0  ;;  %1345 = vmatpush.msrb.mxu3 %v874_v15  ;;  %4056 = vst [vmem:[#allocation17_spill] sm:$0xff] %v3126_v53  ;;  %v3128_v0 = vld [vmem:[#allocation2 + $0xc0] sm:$0xff]  ;;  %v3134_v15 = vld [vmem:[#allocation2 + $0x98] sm:$0xff] }
 0x1a7   : > { %4057 = vst [vmem:[#allocation18_spill] sm:$0xff] %v3128_v0 }
 0x1a8   : > { %1120 = vmatpush.msrb.mxu1 %v869_v33  ;;  %1346 = vmatpush.msrb.mxu3 %v870_v34  ;;  %4058 = vst [vmem:[#allocation19_spill] sm:$0xff] %v3134_v15  ;;  %v3144_v33 = vld [vmem:[#allocation2 + $0xe0] sm:$0xff]  ;;  %v3150_v34 = vld [vmem:[#allocation2 + $0xb8] sm:$0xff] }
 0x1a9   : > { %1256 = vmatmul.f32.gmra.mxu2 %v3082_v52  ;;  %1030 = vmatmul.f32.gmra.mxu0 %v3082_v52  ;;  %4061 = vst [vmem:[#allocation22_spill] sm:$0xff] %v3144_v33 }
 0x1aa   : > { %1121 = vmatpush.msrb.mxu1 %v865_v54  ;;  %1347 = vmatpush.msrb.mxu3 %v866_v32  ;;  %4062 = vst [vmem:[#allocation23_spill] sm:$0xff] %v3150_v34  ;;  %v3152_v54 = vld [vmem:[#allocation2 + $0xf0] sm:$0xff]  ;;  %v3158_v32 = vld [vmem:[#allocation2 + $0xc8] sm:$0xff] }
 0x1ab   : > { %1348 = vmatmul.f32.vlgmr.msrb.gmra.mxu3 %v3034_v39  ;;  %1122 = vmatmul.f32.vlgmr.msrb.gmra.mxu1 %v3034_v39  ;;  %4063 = vst [vmem:[#allocation24_spill] sm:$0xff] %v3152_v54 }
 0x1ac   : > { %1784 = vmatpush.msra.mxu3 %v928_v38  ;;  %1558 = vmatpush.msra.mxu1 %v927_v25  ;;  %4064 = vst [vmem:[#allocation25_spill] sm:$0xff] %v3158_v32  ;;  %v3162_v25 = vld [vmem:[#allocation2 + $0x100] sm:$0xff] }
 0x1ad   : > { %4066 = vst [vmem:[#allocation27_spill] sm:$0xff] %v3162_v25 }
 0x1ae   : > { %1785 = vmatpush.msra.mxu3 %v924_v50  ;;  %1559 = vmatpush.msra.mxu1 %v923_v31  ;;  %v3168_v31 = vld [vmem:[#allocation2 + $0xd8] sm:$0xff] }
 0x1af   : > { %4067 = vst [vmem:[#allocation28_spill] sm:$0xff] %v3168_v31 }
 0x1b0   : > { %1786 = vmatpush.msra.mxu3 %v920_v22  ;;  %1560 = vmatpush.msra.mxu1 %v919_v1  ;;  %v3172_v1 = vld [vmem:[#allocation2 + $0x110] sm:$0xff] }
 0x1b1   : > { %1259 = vmatmul.f32.gmra.mxu2 %v3096_v24  ;;  %1033 = vmatmul.f32.gmra.mxu0 %v3096_v24  ;;  %4068 = vst [vmem:[#allocation29_spill] sm:$0xff] %v3172_v1  ;;  %v4105_v24 = vld [vmem:[#allocation11_spill] sm:$0xff] }
 0x1b2   : > { %1787 = vmatpush.msra.mxu3 %v916_v40  ;;  %1561 = vmatpush.msra.mxu1 %v915_v36  ;;  %v3178_v36 = vld [vmem:[#allocation2 + $0xe8] sm:$0xff] }
 0x1b3   : > { %1351 = vmatmul.f32.gmra.mxu3 %v3048_v41  ;;  %1125 = vmatmul.f32.gmra.mxu1 %v3048_v41  ;;  %4069 = vst [vmem:[#allocation30_spill] sm:$0xff] %v3178_v36 }
 0x1b4   : > { %1788 = vmatpush.msra.mxu3 %v912_v49  ;;  %1562 = vmatpush.msra.mxu1 %v911_v58  ;;  %v3182_v58 = vld [vmem:[#allocation2 + $0x120] sm:$0xff] }
 0x1b5   : > { %4070 = vst [vmem:[#allocation31_spill] sm:$0xff] %v3182_v58 }
 0x1b6   : > { %1789 = vmatpush.msra.mxu3 %v908_v46  ;;  %1563 = vmatpush.msra.mxu1 %v907_v4  ;;  %v3188_v4 = vld [vmem:[#allocation2 + $0xf8] sm:$0xff] }
 0x1b7   : > { %4071 = vst [vmem:[#allocation32_spill] sm:$0xff] %v3188_v4 }
 0x1b8   : > { %1790 = vmatpush.msra.mxu3 %v904_v57  ;;  %1564 = vmatpush.msra.mxu1 %v903_v59  ;;  %v3192_v59 = vld [vmem:[#allocation2 + $0x130] sm:$0xff] }
 0x1b9   : > { %1262 = vmatmul.f32.gmra.mxu2 %v3104_v29  ;;  %1036 = vmatmul.f32.gmra.mxu0 %v3104_v29  ;;  %4072 = vst [vmem:[#allocation33_spill] sm:$0xff] %v3192_v59 }
 0x1ba   : > { %1791 = vmatpush.msra.mxu3 %v900_v62  ;;  %1565 = vmatpush.msra.mxu1 %v899_v11  ;;  %v3198_v11 = vld [vmem:[#allocation2 + $0x108] sm:$0xff] }
 0x1bb   : > { %1354 = vmatmul.f32.gmra.mxu3 %v3064_v63  ;;  %1128 = vmatmul.f32.gmra.mxu1 %v3064_v63  ;;  %4073 = vst [vmem:[#allocation34_spill] sm:$0xff] %v3198_v11 }
 0x1bc   : > { %1792 = vmatpush.msra.mxu3 %v896_v43  ;;  %1566 = vmatpush.msra.mxu1 %v895_v44  ;;  %v3202_v44 = vld [vmem:[#allocation2 + $0x140] sm:$0xff] }
 0x1bd   : > { %4075 = vst [vmem:[#allocation36_spill] sm:$0xff] %v3202_v44 }
 0x1be   : > { %1793 = vmatpush.msra.mxu3 %v892_v12  ;;  %1567 = vmatpush.msra.mxu1 %v891_v61 }
 0x1c0   : > { %1794 = vmatpush.msra.mxu3 %v888_v21  ;;  %1568 = vmatpush.msra.mxu1 %v887_v26  ;;  %v3212_v26 = vld [vmem:[#allocation2 + $0x118] sm:$0xff] }
 0x1c1   : > { %1265 = vmatmul.f32.gmra.mxu2 %v3112_v27  ;;  %1039 = vmatmul.f32.gmra.mxu0 %v3112_v27  ;;  %4077 = vst [vmem:[#allocation38_spill] sm:$0xff] %v3212_v26 }
 0x1c2   : > { %1795 = vmatpush.msra.mxu3 %v884_v23  ;;  %1569 = vmatpush.msra.mxu1 %v883_v42 }
 0x1c3   : > { %1357 = vmatmul.f32.gmra.mxu3 %v3080_v51  ;;  %1131 = vmatmul.f32.gmra.mxu1 %v3080_v51 }
 0x1c4   : > { %1796 = vmatpush.msra.mxu3 %v880_v60  ;;  %1570 = vmatpush.msra.mxu1 %v879_v17  ;;  %v3216_v60 = vld [vmem:[#allocation2 + $0x150] sm:$0xff] }
 0x1c5   : > { %4078 = vst [vmem:[#allocation39_spill] sm:$0xff] %v3216_v60 }
 0x1c6   : > { %1797 = vmatpush.msra.mxu3 %v876_v2  ;;  %1571 = vmatpush.msra.mxu1 %v875_v3 }
 0x1c8   : > { %1798 = vmatpush.msra.mxu3 %v872_v35  ;;  %1572 = vmatpush.msra.mxu1 %v871_v13  ;;  %v3230_v13 = vld [vmem:[#allocation2 + $0x160] sm:$0xff] }
 0x1c9   : > { %1268 = vmatmul.f32.gmra.mxu2 %v3120_v10  ;;  %1042 = vmatmul.f32.gmra.mxu0 %v3120_v10  ;;  %v3160_v38 = vpop.f32.mrf.mxu0  ;;  %4081 = vst [vmem:[#allocation42_spill] sm:$0xff] %v3230_v13 }
 0x1ca   : > { %1799 = vmatpush.msra.mxu3 %v868_v6  ;;  %1573 = vmatpush.msra.mxu1 %v867_v16  ;;  %4065 = vst [vmem:[#allocation26_spill] sm:$0xff] %v3160_v38  ;;  %v3240_v16 = vld [vmem:[#allocation2 + $0x138] sm:$0xff] }
 0x1cb   : > { %1360 = vmatmul.f32.gmra.mxu3 %v3094_v14  ;;  %1134 = vmatmul.f32.gmra.mxu1 %v3094_v14  ;;  %4083 = vst [vmem:[#allocation44_spill] sm:$0xff] %v3240_v16  ;;  %v3374_v14 = vld [vmem:[#allocation2 + $0x1d8] sm:$0xff] }
 0x1cc   : > { %4106 = vst [vmem:[#allocation11_spill] sm:$0xff] %v3374_v14 }
 0x1cf   : > { %v1236_v50 = vpop.f32.mrf.mxu2 }
 0x1d1   : > { %1271 = vmatmul.f32.gmra.mxu2 %v3128_v0  ;;  %1045 = vmatmul.f32.gmra.mxu0 %v3128_v0  ;;  %v3170_v22 = vpop.f32.mrf.mxu0 }
 0x1d3   : > { %1363 = vmatmul.f32.gmra.mxu3 %v3102_v20  ;;  %1137 = vmatmul.f32.gmra.mxu1 %v3102_v20 }
 0x1d7   : > { %v1239_v40 = vpop.f32.mrf.mxu2 }
 0x1d9   : > { %1274 = vmatmul.f32.gmra.mxu2 %v3136_v5  ;;  %1048 = vmatmul.f32.gmra.mxu0 %v3136_v5 }
 0x1db   : > { %1366 = vmatmul.f32.gmra.mxu3 %v3110_v37  ;;  %1140 = vmatmul.f32.gmra.mxu1 %v3110_v37 }
 0x1e1   : > { %1277 = vmatmul.f32.gmra.mxu2 %v3144_v33  ;;  %1051 = vmatmul.f32.gmra.mxu0 %v3144_v33  ;;  %v3318_v33 = vld [vmem:[#allocation2 + $0x1c0] sm:$0xff] }
 0x1e2   : > { %4096 = vst [vmem:[#allocation57_spill] sm:$0xff] %v3318_v33 }
 0x1e3   : > { %1369 = vmatmul.f32.gmra.mxu3 %v3118_v55  ;;  %1143 = vmatmul.f32.gmra.mxu1 %v3118_v55  ;;  %v3358_v55 = vld [vmem:[#allocation2 + $0x1f0] sm:$0xff] }
 0x1e4   : > { %4102 = vst [vmem:[#allocation63_spill] sm:$0xff] %v3358_v55 }
 0x1e9   : > { %1280 = vmatmul.f32.gmra.mxu2 %v3152_v54  ;;  %1054 = vmatmul.f32.gmra.mxu0 %v3152_v54 }
 0x1eb   : > { %1372 = vmatmul.f32.gmra.mxu3 %v3126_v53  ;;  %1146 = vmatmul.f32.gmra.mxu1 %v3126_v53 }
 0x1f1   : > { %1283 = vmatmul.f32.gmra.mxu2 %v3162_v25  ;;  %1057 = vmatmul.f32.gmra.mxu0 %v3162_v25  ;;  %v3302_v25 = vld [vmem:[#allocation2 + $0x1b0] sm:$0xff] }
 0x1f2   : > { %4094 = vst [vmem:[#allocation55_spill] sm:$0xff] %v3302_v25 }
 0x1f3   : > { %1375 = vmatmul.f32.gmra.mxu3 %v3134_v15  ;;  %1149 = vmatmul.f32.gmra.mxu1 %v3134_v15  ;;  %v3348_v15 = vld [vmem:[#allocation2 + $0x1e0] sm:$0xff] }
 0x1f4   : > { %4100 = vst [vmem:[#allocation61_spill] sm:$0xff] %v3348_v15 }
 0x1f8   : > { %v3180_v49 = vpop.f32.mrf.mxu0 }
 0x1f9   : > { %1286 = vmatmul.f32.gmra.mxu2 %v3172_v1  ;;  %1060 = vmatmul.f32.gmra.mxu0 %v3172_v1 }
 0x1fb   : > { %1378 = vmatmul.f32.gmra.mxu3 %v3142_v9  ;;  %1152 = vmatmul.f32.gmra.mxu1 %v3142_v9 }
 0x1fe   : > { %v1242_v46 = vpop.f32.mrf.mxu2 }
 0x200   : > { %v3190_v57 = vpop.f32.mrf.mxu0 }
 0x201   : > { %1289 = vmatmul.f32.gmra.mxu2 %v3182_v58  ;;  %1063 = vmatmul.f32.gmra.mxu0 %v3182_v58 }
 0x203   : > { %1381 = vmatmul.f32.gmra.mxu3 %v3150_v34  ;;  %1155 = vmatmul.f32.gmra.mxu1 %v3150_v34 }
 0x206   : > { %v1245_v62 = vpop.f32.mrf.mxu2 }
 0x209   : > { %1292 = vmatmul.f32.gmra.mxu2 %v3192_v59  ;;  %1066 = vmatmul.f32.gmra.mxu0 %v3192_v59  ;;  %v3270_v59 = vld [vmem:[#allocation2 + $0x190] sm:$0xff] }
 0x20a   : > { %4090 = vst [vmem:[#allocation51_spill] sm:$0xff] %v3270_v59 }
 0x20b   : > { %1384 = vmatmul.f32.gmra.mxu3 %v3158_v32  ;;  %1158 = vmatmul.f32.gmra.mxu1 %v3158_v32 }
 0x20e   : > { %v3204_v12 = vpop.f32.mrf.mxu0 }
 0x211   : > { %1295 = vmatmul.f32.gmra.mxu2 %v3202_v44  ;;  %1069 = vmatmul.f32.gmra.mxu0 %v3202_v44 }
 0x213   : > { %1387 = vmatmul.f32.gmra.mxu3 %v3168_v31  ;;  %1161 = vmatmul.f32.gmra.mxu1 %v3168_v31 }
 0x214   : > { %v1248_v42 = vpop.f32.mrf.mxu2 }
 0x216   : > { %v3218_v17 = vpop.f32.mrf.mxu0 }
 0x219   : > { %1298 = vmatmul.f32.gmra.mxu2 %v3216_v60  ;;  %1072 = vmatmul.f32.gmra.mxu0 %v3216_v60 }
 0x21b   : > { %1390 = vmatmul.f32.gmra.mxu3 %v3178_v36  ;;  %1164 = vmatmul.f32.gmra.mxu1 %v3178_v36  ;;  %v3286_v36 = vld [vmem:[#allocation2 + $0x1a0] sm:$0xff] }
 0x21c   : > { %v1251_v48 = vpop.f32.mrf.mxu2  ;;  %4092 = vst [vmem:[#allocation53_spill] sm:$0xff] %v3286_v36 }
 0x21e   : > { %v3232_v7 = vpop.f32.mrf.mxu0 }
 0x221   : > { %1301 = vmatmul.f32.gmra.mxu2 %v3230_v13  ;;  %1075 = vmatmul.f32.gmra.mxu0 %v3230_v13 }
 0x223   : > { %1393 = vmatmul.f32.gmra.mxu3 %v3188_v4  ;;  %1167 = vmatmul.f32.gmra.mxu1 %v3188_v4 }
 0x228   : > { %v3200_v43 = vpop.f32.mrf.mxu1 }
 0x229   : > { %4074 = vst [vmem:[#allocation35_spill] sm:$0xff] %v3200_v43 }
 0x22b   : > { %1396 = vmatmul.f32.gmra.mxu3 %v3198_v11  ;;  %1170 = vmatmul.f32.gmra.mxu1 %v3198_v11 }
 0x22e   : > { %v1349_v61 = vpop.f32.mrf.mxu3 }
 0x22f   : > { %v3210_v21 = vadd.f32 %v1349_v61, %v1236_v50  ;;  %v3244_v61 = vld [vmem:[#allocation2 + $0x170] sm:$0xff] }
 0x230   : > { %v3214_v23 = vpop.f32.mrf.mxu1  ;;  %4084 = vst [vmem:[#allocation45_spill] sm:$0xff] %v3244_v61  ;;  %1304 = vmatmul.f32.gmra.mxu2 %v3244_v61  ;;  %1078 = vmatmul.f32.gmra.mxu0 %v3244_v61 }
 0x231   : > { %4076 = vst [vmem:[#allocation37_spill] sm:$0xff] %v3210_v21 }
 0x233   : > { %1399 = vmatmul.f32.gmra.mxu3 %v3212_v26  ;;  %1173 = vmatmul.f32.gmra.mxu1 %v3212_v26  ;;  %v3258_v26 = vld [vmem:[#allocation2 + $0x180] sm:$0xff] }
 0x234   : > { %4087 = vst [vmem:[#allocation48_spill] sm:$0xff] %v3258_v26 }
 0x236   : > { %v1352_v2 = vpop.f32.mrf.mxu3 }
 0x237   : > { %v3224_v3 = vadd.f32 %v1352_v2, %v1239_v40  ;;  %v1254_v40 = vpop.f32.mrf.mxu2  ;;  %v3246_v2 = vpop.f32.mrf.mxu0 }
 0x238   : > { %v3228_v35 = vpop.f32.mrf.mxu1  ;;  %1307 = vmatmul.f32.gmra.mxu2 %v3258_v26  ;;  %1081 = vmatmul.f32.gmra.mxu0 %v3258_v26 }
 0x239   : > { %4079 = vst [vmem:[#allocation40_spill] sm:$0xff] %v3224_v3 }
 0x23b   : > { %1402 = vmatmul.f32.gmra.mxu3 %v3226_v30  ;;  %1176 = vmatmul.f32.gmra.mxu1 %v3226_v30 }
 0x23e   : > { %v1355_v6 = vpop.f32.mrf.mxu3 }
 0x23f   : > { %v3238_v18 = vadd.f32 %v1355_v6, %v1242_v46  ;;  %v3254_v6 = vld [vmem:[#allocation2 + $0x148] sm:$0xff]  ;;  %v1257_v60 = vpop.f32.mrf.mxu2  ;;  %v1034_v44 = vpop.f32.mrf.mxu0 }
 0x240   : > { %v3242_v50 = vpop.f32.mrf.mxu1  ;;  %4086 = vst [vmem:[#allocation47_spill] sm:$0xff] %v3254_v6  ;;  %1310 = vmatmul.f32.gmra.mxu2 %v3270_v59  ;;  %1084 = vmatmul.f32.gmra.mxu0 %v3270_v59  ;;  %v3296_v59 = vld [vmem:[#allocation2 + $0x178] sm:$0xff] }
 0x241   : > { %4082 = vst [vmem:[#allocation43_spill] sm:$0xff] %v3238_v18  ;;  %v3392_v18 = vld [vmem:[#allocation2 + $0x1f8] sm:$0xff] }
 0x242   : > { %4093 = vst [vmem:[#allocation54_spill] sm:$0xff] %v3296_v59 }
 0x243   : > { %1405 = vmatmul.f32.gmra.mxu3 %v3240_v16  ;;  %1179 = vmatmul.f32.gmra.mxu1 %v3240_v16  ;;  %4110 = vst [vmem:[#allocation69_spill] sm:$0xff] %v3392_v18 }
 0x246   : > { %v1358_v13 = vpop.f32.mrf.mxu3 }
 0x247   : > { %v3252_v46 = vadd.f32 %v1358_v13, %v1245_v62  ;;  %v3266_v62 = vld [vmem:[#allocation2 + $0x158] sm:$0xff]  ;;  %v1260_v11 = vpop.f32.mrf.mxu2  ;;  %v3272_v4 = vpop.f32.mrf.mxu0 }
 0x248   : > { %v3256_v30 = vpop.f32.mrf.mxu1  ;;  %4089 = vst [vmem:[#allocation50_spill] sm:$0xff] %v3266_v62  ;;  %1313 = vmatmul.f32.gmra.mxu2 %v3286_v36  ;;  %1087 = vmatmul.f32.gmra.mxu0 %v3286_v36  ;;  %v3312_v36 = vld [vmem:[#allocation2 + $0x188] sm:$0xff] }
 0x249   : > { %4085 = vst [vmem:[#allocation46_spill] sm:$0xff] %v3252_v46 }
 0x24a   : > { %4095 = vst [vmem:[#allocation56_spill] sm:$0xff] %v3312_v36 }
 0x24b   : > { %1408 = vmatmul.f32.gmra.mxu3 %v3254_v6  ;;  %1182 = vmatmul.f32.gmra.mxu1 %v3254_v6 }
 0x24e   : > { %v1361_v61 = vpop.f32.mrf.mxu3 }
 0x24f   : > { %v3264_v16 = vadd.f32 %v1361_v61, %v1248_v42  ;;  %v3280_v61 = vld [vmem:[#allocation2 + $0x168] sm:$0xff]  ;;  %v3284_v58 = vpop.f32.mrf.mxu2  ;;  %v3288_v1 = vpop.f32.mrf.mxu0 }
 0x250   : > { %v3268_v13 = vpop.f32.mrf.mxu1  ;;  %4091 = vst [vmem:[#allocation52_spill] sm:$0xff] %v3280_v61  ;;  %1316 = vmatmul.f32.gmra.mxu2 %v3302_v25  ;;  %1090 = vmatmul.f32.gmra.mxu0 %v3302_v25  ;;  %v3328_v25 = vld [vmem:[#allocation2 + $0x198] sm:$0xff] }
 0x251   : > { %4088 = vst [vmem:[#allocation49_spill] sm:$0xff] %v3264_v16 }
 0x252   : > { %4097 = vst [vmem:[#allocation58_spill] sm:$0xff] %v3328_v25 }
 0x253   : > { %1411 = vmatmul.f32.gmra.mxu3 %v3266_v62  ;;  %1185 = vmatmul.f32.gmra.mxu1 %v3266_v62 }
 0x256   : > { %v1364_v26 = vpop.f32.mrf.mxu3 }
 0x257   : > { %v3278_v42 = vadd.f32 %v1364_v26, %v1251_v48  ;;  %v3300_v31 = vpop.f32.mrf.mxu2  ;;  %v3304_v32 = vpop.f32.mrf.mxu0 }
 0x258   : > { %v3282_v6 = vpop.f32.mrf.mxu1  ;;  %1319 = vmatmul.f32.gmra.mxu2 %v3318_v33  ;;  %1093 = vmatmul.f32.gmra.mxu0 %v3318_v33 }
 0x25b   : > { %1414 = vmatmul.f32.gmra.mxu3 %v3280_v61  ;;  %1188 = vmatmul.f32.gmra.mxu1 %v3280_v61 }
 0x25e   : > { %v1367_v26 = vpop.f32.mrf.mxu3 }
 0x25f   : > { %v3294_v48 = vadd.f32 %v1367_v26, %v1254_v40  ;;  %v3314_v54 = vpop.f32.mrf.mxu2  ;;  %v3320_v9 = vpop.f32.mrf.mxu0 }
 0x260   : > { %v3298_v62 = vpop.f32.mrf.mxu1 }
 0x263   : > { %1417 = vmatmul.f32.gmra.mxu3 %v3296_v59  ;;  %1191 = vmatmul.f32.gmra.mxu1 %v3296_v59 }
 0x266   : > { %v1370_v40 = vpop.f32.mrf.mxu3 }
 0x267   : > { %v3310_v26 = vadd.f32 %v1370_v40, %v1257_v60  ;;  %v1049_v5 = vpop.f32.mrf.mxu0 }
 0x268   : > { %v1147_v61 = vpop.f32.mrf.mxu1 }
 0x269   : > { %v3316_v34 = vadd.f32 %v1147_v61, %v1034_v44  ;;  %v3332_v44 = vpop.f32.mrf.mxu2  ;;  %v3334_v61 = vld [vmem:[#allocation2 + $0x1d0] sm:$0xff] }
 0x26a   : > { %4098 = vst [vmem:[#allocation59_spill] sm:$0xff] %v3334_v61  ;;  %1322 = vmatmul.f32.gmra.mxu2 %v3334_v61  ;;  %1096 = vmatmul.f32.gmra.mxu0 %v3334_v61 }
 0x26b   : > { %1420 = vmatmul.f32.gmra.mxu3 %v3312_v36  ;;  %1194 = vmatmul.f32.gmra.mxu1 %v3312_v36 }
 0x26e   : > { %v1373_v60 = vpop.f32.mrf.mxu3 }
 0x26f   : > { %v3326_v40 = vadd.f32 %v1373_v60, %v1260_v11  ;;  %v3342_v11 = vld [vmem:[#allocation2 + $0x1a8] sm:$0xff]  ;;  %v1052_v0 = vpop.f32.mrf.mxu0 }
 0x270   : > { %v3330_v59 = vpop.f32.mrf.mxu1  ;;  %4099 = vst [vmem:[#allocation60_spill] sm:$0xff] %v3342_v11 }
 0x271   : > { %v3346_v36 = vpop.f32.mrf.mxu2 }
 0x272   : > { %1325 = vmatmul.f32.gmra.mxu2 %v3348_v15  ;;  %1099 = vmatmul.f32.gmra.mxu0 %v3348_v15  ;;  %v3366_v15 = vld [vmem:[#allocation2 + $0x1c8] sm:$0xff] }
 0x273   : > { %1423 = vmatmul.f32.gmra.mxu3 %v3328_v25  ;;  %1197 = vmatmul.f32.gmra.mxu1 %v3328_v25  ;;  %v3356_v25 = vld [vmem:[#allocation2 + $0x1b8] sm:$0xff]  ;;  %4103 = vst [vmem:[#allocation64_spill] sm:$0xff] %v3366_v15 }
 0x274   : > { %4101 = vst [vmem:[#allocation62_spill] sm:$0xff] %v3356_v25 }
 0x276   : > { %v3340_v33 = vpop.f32.mrf.mxu3 }
 0x277   : > { %v1055_v27 = vpop.f32.mrf.mxu0 }
 0x278   : > { %v3344_v60 = vpop.f32.mrf.mxu1 }
 0x279   : > { %v1278_v10 = vpop.f32.mrf.mxu2 }
 0x27a   : > { %1328 = vmatmul.f32.gmra.mxu2 %v3358_v55  ;;  %1102 = vmatmul.f32.gmra.mxu0 %v3358_v55 }
 0x27b   : > { %1426 = vmatmul.f32.gmra.mxu3 %v3342_v11  ;;  %1200 = vmatmul.f32.gmra.mxu1 %v3342_v11 }
 0x27e   : > { %v3354_v61 = vpop.f32.mrf.mxu3 }
 0x27f   : > { %v3368_v20 = vpop.f32.mrf.mxu0 }
 0x280   : > { %v1156_v53 = vpop.f32.mrf.mxu1  ;;  %4104 = vst [vmem:[#allocation65_spill] sm:$0xff] %v3368_v20  ;;  %v3382_v20 = vld [vmem:[#allocation2 + $0x1e8] sm:$0xff] }
 0x281   : > { %v1281_v29 = vpop.f32.mrf.mxu2  ;;  %4108 = vst [vmem:[#allocation67_spill] sm:$0xff] %v3382_v20 }
 0x282   : > { %1687 = vmatmul.f32.vlgmr.msra.gmra.mxu2 %v4105_v24  ;;  %1461 = vmatmul.f32.vlgmr.msra.gmra.mxu0 %v4105_v24 }
 0x283   : > { %1429 = vmatmul.f32.gmra.mxu3 %v3356_v25  ;;  %1203 = vmatmul.f32.gmra.mxu1 %v3356_v25 }
 0x286   : > { %v3364_v11 = vpop.f32.mrf.mxu3 }
 0x287   : > { %v3376_v52 = vpop.f32.mrf.mxu0 }
 0x288   : > { %v1159_v37 = vpop.f32.mrf.mxu1  ;;  %4107 = vst [vmem:[#allocation66_spill] sm:$0xff] %v3376_v52 }
 0x289   : > { %v1284_v21 = vpop.f32.mrf.mxu2 }
 0x28a   : > { %1690 = vmatmul.f32.gmra.mxu2 %v3004_v19  ;;  %1464 = vmatmul.f32.gmra.mxu0 %v3004_v19 }
 0x28b   : > { %1432 = vmatmul.f32.gmra.mxu3 %v3366_v15  ;;  %1206 = vmatmul.f32.gmra.mxu1 %v3366_v15 }
 0x28e   : > { %v1385_v25 = vpop.f32.mrf.mxu3 }
 0x28f   : > { %v3386_v51 = vpop.f32.mrf.mxu0 }
 0x290   : > { %v1162_v55 = vpop.f32.mrf.mxu1  ;;  %4109 = vst [vmem:[#allocation68_spill] sm:$0xff] %v3386_v51 }
 0x291   : > { %v3384_v24 = vpop.f32.mrf.mxu2  ;;  %v1163_v43 = vadd.f32 %v1162_v55, %v1049_v5  ;;  %v1157_v55 = vadd.f32 %v1156_v53, %v3304_v32 }
 0x292   : > { %1693 = vmatmul.f32.gmra.mxu2 %v3012_v56  ;;  %1467 = vmatmul.f32.gmra.mxu0 %v3012_v56  ;;  %v1160_v56 = vadd.f32 %v1159_v37, %v3320_v9  ;;  %v1154_v37 = vadd.f32 %v3344_v60, %v3288_v1 }
 0x293   : > { %1435 = vmatmul.f32.gmra.mxu3 %v3374_v14  ;;  %1209 = vmatmul.f32.gmra.mxu1 %v3374_v14 }
 0x294   : > { %v1945_v9 = vmax.f32 %v1160_v56, 0.0 }
 0x296   : > { %v1388_v15 = vpop.f32.mrf.mxu3 }
 0x297   : > { %v3396_v45 = vpop.f32.mrf.mxu0 }
 0x298   : > { %v1165_v3 = vpop.f32.mrf.mxu1 }
 0x299   : > { %v1166_v52 = vadd.f32 %v1165_v3, %v1052_v0  ;;  %v3394_v46 = vpop.f32.mrf.mxu2  ;;  %v1949_v3 = vmax.f32 %v1163_v43, 0.0 }
 0x29a   : > { %1696 = vmatmul.f32.gmra.mxu2 %v3024_v47  ;;  %1470 = vmatmul.f32.gmra.mxu0 %v3024_v47  ;;  %v1386_v47 = vadd.f32 %v1385_v25, %v3332_v44 }
 0x29b   : > { %1438 = vmatmul.f32.gmra.mxu3 %v3382_v20  ;;  %1212 = vmatmul.f32.gmra.mxu1 %v3382_v20  ;;  %v1953_v51 = vmax.f32 %v1166_v52, 0.0 }
 0x29c   : > { %v1946_v25 = vmax.f32 %v1386_v47, 0.0 }
 0x29e   : > { %v1391_v14 = vpop.f32.mrf.mxu3 }
 0x29f   : > { %v1392_v20 = vadd.f32 %v1391_v14, %v1278_v10  ;;  %v1383_v10 = vadd.f32 %v3364_v11, %v3314_v54 }
 0x2a0   : > { %v1168_v19 = vpop.f32.mrf.mxu1 }
 0x2a1   : > { %v1169_v16 = vadd.f32 %v1168_v19, %v1055_v27  ;;  %v3406_v52 = vpop.f32.mrf.mxu2  ;;  %v3411_v19 = vpop.f32.mrf.mxu0  ;;  %v1954_v14 = vmax.f32 %v1392_v20, 0.0  ;;  %v1380_v20 = vadd.f32 %v3354_v61, %v3300_v31  ;;  %v1942_v43 = vmax.f32 %v1383_v10, 0.0  ;;  %v4119_v10 = vld [vmem:[#allocation7_spill] sm:$0xff] }
 0x2a2   : > { %1699 = vmatmul.f32.gmra.mxu2 %v3036_v28  ;;  %1473 = vmatmul.f32.gmra.mxu0 %v3036_v28  ;;  %v1142_v31 = vadd.f32 %v3282_v6, %v3232_v7  ;;  %v1930_v6 = vmax.f32 %v3326_v40, 0.0  ;;  %v1130_v40 = vadd.f32 %v3228_v35, %v3180_v49  ;;  %v4111_v49 = vld [vmem:[#allocation26_spill] sm:$0xff]  ;;  %v4112_v35 = vld [vmem:[#allocation35_spill] sm:$0xff] }
 0x2a3   : > { %1441 = vmatmul.f32.gmra.mxu3 %v3392_v18  ;;  %v1957_v38 = vmax.f32 %v1169_v16, 0.0  ;;  %1215 = vmatmul.f32.gmra.mxu1 %v3392_v18  ;;  %v1389_v16 = vadd.f32 %v1388_v15, %v3346_v36  ;;  %v1937_v15 = vmax.f32 %v1154_v37, 0.0 }
 0x2a4   : > { %v1905_v56 = vmax.f32 %v1130_v40, 0.0 }
 0x2a5   : > { %2027 = vmatpush.msrb.mxu0 %v1957_v38  ;;  %v1950_v53 = vmax.f32 %v1389_v16, 0.0 }
 0x2a6   : > { %v1394_v0 = vpop.f32.mrf.mxu3 }
 0x2a7   : > { %v1395_v27 = vadd.f32 %v1394_v0, %v1281_v29  ;;  %2028 = vmatpush.msrb.mxu0 %v1953_v51  ;;  %v1151_v51 = vadd.f32 %v3330_v59, %v3272_v4  ;;  %v1941_v29 = vmax.f32 %v1157_v55, 0.0  ;;  %v1377_v59 = vadd.f32 %v3340_v33, %v3284_v58 }
 0x2a8   : > { %v3404_v5 = vpop.f32.mrf.mxu1  ;;  %v1136_v58 = vadd.f32 %v3256_v30, %v3204_v12  ;;  %v1926_v30 = vmax.f32 %v3310_v26, 0.0  ;;  %v1918_v26 = vmax.f32 %v3278_v42, 0.0  ;;  %v4115_v42 = vld [vmem:[#allocation46_spill] sm:$0xff] }
 0x2a9   : > { %v1958_v38 = vmax.f32 %v1395_v27, 0.0  ;;  %2029 = vmatpush.msrb.mxu0 %v1949_v3  ;;  %v1933_v54 = vmax.f32 %v1151_v51, 0.0  ;;  %v3430_v4 = vpop.f32.mrf.mxu2  ;;  %v3437_v28 = vpop.f32.mrf.mxu0  ;;  %v1934_v33 = vmax.f32 %v1377_v59, 0.0  ;;  %v4114_v3 = vld [vmem:[#allocation49_spill] sm:$0xff]  ;;  %v1910_v16 = vmax.f32 %v4115_v42, 0.0 }
 0x2aa   : > { %1702 = vmatmul.f32.gmra.mxu2 %v3052_v8  ;;  %1476 = vmatmul.f32.gmra.mxu0 %v3052_v8  ;;  %v1913_v11 = vmax.f32 %v1136_v58, 0.0  ;;  %v1922_v8 = vmax.f32 %v3294_v48, 0.0  ;;  %v4113_v48 = vld [vmem:[#allocation9_spill] sm:$0xff]  ;;  %v1914_v27 = vmax.f32 %v4114_v3, 0.0  ;;  %v4130_v3 = vld [vmem:[#allocation18_spill] sm:$0xff] }
 0x2ab   : > { %1800 = vmatmul.f32.vlgmr.msra.gmra.mxu3 %v3034_v39  ;;  %2067 = vmatpush.msrb.mxu2 %v1958_v38 }
 0x2ac   : > { %1574 = vmatmul.f32.vlgmr.msra.gmra.mxu1 %v3034_v39  ;;  %2030 = vmatpush.msrb.mxu0 %v1945_v9  ;;  %v1145_v39 = vadd.f32 %v3298_v62, %v3246_v2  ;;  %v1938_v2 = vmax.f32 %v1380_v20, 0.0  ;;  %v1139_v62 = vadd.f32 %v3268_v13, %v3218_v17  ;;  %v4116_v9 = vld [vmem:[#allocation43_spill] sm:$0xff] }
 0x2ad   : > { %2068 = vmatpush.msrb.mxu2 %v1954_v14  ;;  %v1906_v47 = vmax.f32 %v4116_v9, 0.0  ;;  %v4117_v14 = vld [vmem:[#allocation10_spill] sm:$0xff]  ;;  %v4132_v9 = vld [vmem:[#allocation20_spill] sm:$0xff] }
 0x2ae   : > { %v1397_v32 = vpop.f32.mrf.mxu3  ;;  %2031 = vmatpush.msrb.mxu0 %v1941_v29  ;;  %v1925_v44 = vmax.f32 %v1145_v39, 0.0  ;;  %v1917_v17 = vmax.f32 %v1139_v62, 0.0  ;;  %v4123_v62 = vld [vmem:[#allocation6_spill] sm:$0xff] }
 0x2af   : > { %v3423_v1 = vadd.f32 %v1397_v32, %v1284_v21  ;;  %2069 = vmatpush.msrb.mxu2 %v1950_v53  ;;  %v1929_v21 = vmax.f32 %v3316_v34, 0.0  ;;  %v1921_v34 = vmax.f32 %v1142_v31, 0.0  ;;  %v4120_v53 = vld [vmem:[#allocation37_spill] sm:$0xff] }
 0x2b0   : > { %2032 = vmatpush.msrb.mxu0 %v1937_v15  ;;  %v3428_v36 = vpop.f32.mrf.mxu1  ;;  %v1898_v15 = vmax.f32 %v4120_v53, 0.0 }
 0x2b1   : > { %2070 = vmatpush.msrb.mxu2 %v1946_v25  ;;  %v3455_v12 = vpop.f32.mrf.mxu2  ;;  %v3460_v60 = vpop.f32.mrf.mxu0 }
 0x2b2   : > { %2033 = vmatpush.msrb.mxu0 %v1933_v54  ;;  %1705 = vmatmul.f32.gmra.mxu2 %v4113_v48  ;;  %v4121_v54 = vld [vmem:[#allocation8_spill] sm:$0xff] }
 0x2b3   : > { %1803 = vmatmul.f32.gmra.mxu3 %v3048_v41  ;;  %2071 = vmatpush.msrb.mxu2 %v1942_v43  ;;  %v4122_v43 = vld [vmem:[#allocation5_spill] sm:$0xff] }
 0x2b4   : > { %1577 = vmatmul.f32.gmra.mxu1 %v3048_v41  ;;  %2034 = vmatpush.msrb.mxu0 %v1929_v21  ;;  %v1133_v41 = vadd.f32 %v3242_v50, %v3190_v57  ;;  %v1127_v57 = vadd.f32 %v3214_v23, %v3170_v22 }
 0x2b5   : > { %2072 = vmatpush.msrb.mxu2 %v1938_v2  ;;  %1479 = vmatmul.f32.gmra.mxu0 %v4113_v48 }
 0x2b6   : > { %v1400_v7 = vpop.f32.mrf.mxu3  ;;  %2035 = vmatpush.msrb.mxu0 %v1925_v44  ;;  %v1909_v50 = vmax.f32 %v1133_v41, 0.0 }
 0x2b7   : > { %v3448_v61 = vadd.f32 %v1400_v7, %v3384_v24  ;;  %2073 = vmatpush.msrb.mxu2 %v1934_v33  ;;  %v1124_v24 = vadd.f32 %v4112_v35, %v4111_v49  ;;  %v4124_v33 = vld [vmem:[#allocation14_spill] sm:$0xff] }
 0x2b8   : > { %2036 = vmatpush.msrb.mxu0 %v1921_v34  ;;  %v3453_v13 = vpop.f32.mrf.mxu1 }
 0x2b9   : > { %2074 = vmatpush.msrb.mxu2 %v1930_v6  ;;  %v1302_v23 = vpop.f32.mrf.mxu2  ;;  %v1897_v38 = vmax.f32 %v1124_v24, 0.0  ;;  %v3479_v37 = vpop.f32.mrf.mxu0  ;;  %v4125_v6 = vld [vmem:[#allocation15_spill] sm:$0xff] }
 0x2ba   : > { %2037 = vmatpush.msrb.mxu0 %v1917_v17  ;;  %1708 = vmatmul.f32.gmra.mxu2 %v4119_v10  ;;  %v4126_v17 = vld [vmem:[#allocation12_spill] sm:$0xff] }
 0x2bb   : > { %1806 = vmatmul.f32.gmra.mxu3 %v3064_v63  ;;  %2075 = vmatpush.msrb.mxu2 %v1926_v30 }
 0x2bc   : > { %1580 = vmatmul.f32.gmra.mxu1 %v3064_v63  ;;  %2038 = vmatpush.msrb.mxu0 %v1913_v11  ;;  %v1901_v63 = vmax.f32 %v1127_v57, 0.0 }
 0x2bd   : > { %2076 = vmatpush.msrb.mxu2 %v1922_v8  ;;  %1482 = vmatmul.f32.gmra.mxu0 %v4119_v10  ;;  %v4127_v8 = vld [vmem:[#allocation13_spill] sm:$0xff]  ;;  %v4134_v10 = vld [vmem:[#allocation22_spill] sm:$0xff] }
 0x2be   : > { %v1403_v0 = vpop.f32.mrf.mxu3  ;;  %2039 = vmatpush.msrb.mxu0 %v1909_v50  ;;  %v4128_v50 = vld [vmem:[#allocation16_spill] sm:$0xff] }
 0x2bf   : > { %v3473_v55 = vadd.f32 %v1403_v0, %v3394_v46  ;;  %2077 = vmatpush.msrb.mxu2 %v1918_v26  ;;  %v4118_v46 = vld [vmem:[#allocation40_spill] sm:$0xff]  ;;  %v4129_v0 = vld [vmem:[#allocation17_spill] sm:$0xff] }
 0x2c0   : > { %2040 = vmatpush.msrb.mxu0 %v1905_v56  ;;  %v3476_v22 = vpop.f32.mrf.mxu1  ;;  %v1902_v51 = vmax.f32 %v4118_v46, 0.0 }
 0x2c1   : > { %2078 = vmatpush.msrb.mxu2 %v1914_v27  ;;  %v1305_v25 = vpop.f32.mrf.mxu2  ;;  %v1082_v39 = vpop.f32.mrf.mxu0 }
 0x2c2   : > { %2041 = vmatpush.msrb.mxu0 %v1901_v63  ;;  %1711 = vmatmul.f32.gmra.mxu2 %v4122_v43 }
 0x2c3   : > { %1809 = vmatmul.f32.gmra.mxu3 %v4117_v14  ;;  %2079 = vmatpush.msrb.mxu2 %v1910_v16  ;;  %v4131_v16 = vld [vmem:[#allocation19_spill] sm:$0xff] }
 0x2c4   : > { %1583 = vmatmul.f32.gmra.mxu1 %v4117_v14  ;;  %2042 = vmatpush.msrb.mxu0 %v1897_v38 }
 0x2c5   : > { %2080 = vmatpush.msrb.mxu2 %v1906_v47  ;;  %1485 = vmatmul.f32.gmra.mxu0 %v4122_v43 }
 0x2c6   : > { %v1406_v29 = vpop.f32.mrf.mxu3 }
 0x2c7   : > { %v3488_v32 = vadd.f32 %v1406_v29, %v3406_v52  ;;  %2081 = vmatpush.msrb.mxu2 %v1902_v51  ;;  %v4133_v51 = vld [vmem:[#allocation21_spill] sm:$0xff] }
 0x2c8   : > { %v3491_v20 = vpop.f32.mrf.mxu1 }
 0x2c9   : > { %2082 = vmatpush.msrb.mxu2 %v1898_v15  ;;  %v1308_v21 = vpop.f32.mrf.mxu2  ;;  %v3502_v2 = vpop.f32.mrf.mxu0 }
 0x2ca   : > { %1714 = vmatmul.f32.gmra.mxu2 %v4124_v33 }
 0x2cb   : > { %1812 = vmatmul.f32.gmra.mxu3 %v4121_v54 }
 0x2cc   : > { %1586 = vmatmul.f32.gmra.mxu1 %v4121_v54 }
 0x2cd   : > { %1488 = vmatmul.f32.gmra.mxu0 %v4124_v33 }
 0x2ce   : > { %v1409_v59 = vpop.f32.mrf.mxu3 }
 0x2cf   : > { %v3497_v31 = vadd.f32 %v1409_v59, %v3430_v4  ;;  %v4136_v59 = vld [vmem:[#allocation24_spill] sm:$0xff] }
 0x2d0   : > { %v3500_v52 = vpop.f32.mrf.mxu1 }
 0x2d1   : > { %v3513_v34 = vpop.f32.mrf.mxu2  ;;  %v3515_v7 = vpop.f32.mrf.mxu0 }
 0x2d2   : > { %1717 = vmatmul.f32.gmra.mxu2 %v4126_v17 }
 0x2d3   : > { %1815 = vmatmul.f32.gmra.mxu3 %v4123_v62 }
 0x2d4   : > { %1589 = vmatmul.f32.gmra.mxu1 %v4123_v62 }
 0x2d5   : > { %1491 = vmatmul.f32.gmra.mxu0 %v4126_v17 }
 0x2d6   : > { %v1412_v44 = vpop.f32.mrf.mxu3 }
 0x2d7   : > { %v3508_v58 = vadd.f32 %v1412_v44, %v3455_v12  ;;  %v4138_v44 = vld [vmem:[#allocation25_spill] sm:$0xff] }
 0x2d8   : > { %v3511_v4 = vpop.f32.mrf.mxu1 }
 0x2d9   : > { %v3525_v40 = vpop.f32.mrf.mxu2  ;;  %v3527_v11 = vpop.f32.mrf.mxu0 }
 0x2da   : > { %1720 = vmatmul.f32.gmra.mxu2 %v4128_v50 }
 0x2db   : > { %1818 = vmatmul.f32.gmra.mxu3 %v4125_v6 }
 0x2dc   : > { %1592 = vmatmul.f32.gmra.mxu1 %v4125_v6  ;;  %v4139_v6 = vld [vmem:[#allocation27_spill] sm:$0xff] }
 0x2dd   : > { %1494 = vmatmul.f32.gmra.mxu0 %v4128_v50 }
 0x2de   : > { %v1415_v41 = vpop.f32.mrf.mxu3 }
 0x2df   : > { %v3520_v30 = vadd.f32 %v1415_v41, %v1302_v23 }
 0x2e0   : > { %v3523_v12 = vpop.f32.mrf.mxu1 }
 0x2e1   : > { %v3535_v35 = vpop.f32.mrf.mxu2  ;;  %v3539_v56 = vpop.f32.mrf.mxu0 }
 0x2e2   : > { %1723 = vmatmul.f32.gmra.mxu2 %v4130_v3 }
 0x2e3   : > { %1821 = vmatmul.f32.gmra.mxu3 %v4127_v8 }
 0x2e4   : > { %1595 = vmatmul.f32.gmra.mxu1 %v4127_v8 }
 0x2e5   : > { %1497 = vmatmul.f32.gmra.mxu0 %v4130_v3 }
 0x2e6   : > { %v1418_v57 = vpop.f32.mrf.mxu3 }
 0x2e7   : > { %v3532_v26 = vadd.f32 %v1418_v57, %v1305_v25  ;;  %v4141_v57 = vld [vmem:[#allocation28_spill] sm:$0xff] }
 0x2e8   : > { %v1195_v49 = vpop.f32.mrf.mxu1 }
 0x2e9   : > { %v3537_v24 = vadd.f32 %v1195_v49, %v1082_v39  ;;  %v3549_v23 = vpop.f32.mrf.mxu2  ;;  %v1097_v42 = vpop.f32.mrf.mxu0  ;;  %v4135_v39 = vld [vmem:[#allocation23_spill] sm:$0xff]  ;;  %v4142_v49 = vld [vmem:[#allocation29_spill] sm:$0xff] }
 0x2ea   : > { %1726 = vmatmul.f32.gmra.mxu2 %v4132_v9 }
 0x2eb   : > { %1824 = vmatmul.f32.gmra.mxu3 %v4129_v0 }
 0x2ec   : > { %1598 = vmatmul.f32.gmra.mxu1 %v4129_v0 }
 0x2ed   : > { %1500 = vmatmul.f32.gmra.mxu0 %v4132_v9 }
 0x2ee   : > { %v1421_v48 = vpop.f32.mrf.mxu3 }
 0x2ef   : > { %v3544_v27 = vadd.f32 %v1421_v48, %v1308_v21 }
 0x2f0   : > { %v3547_v63 = vpop.f32.mrf.mxu1 }
 0x2f1   : > { %v3557_v14 = vpop.f32.mrf.mxu2  ;;  %v1100_v46 = vpop.f32.mrf.mxu0 }
 0x2f2   : > { %1729 = vmatmul.f32.gmra.mxu2 %v4134_v10 }
 0x2f3   : > { %1827 = vmatmul.f32.gmra.mxu3 %v4131_v16 }
 0x2f4   : > { %1601 = vmatmul.f32.gmra.mxu1 %v4131_v16  ;;  %v4144_v16 = vld [vmem:[#allocation30_spill] sm:$0xff] }
 0x2f5   : > { %1503 = vmatmul.f32.gmra.mxu0 %v4134_v10 }
 0x2f6   : > { %v3553_v38 = vpop.f32.mrf.mxu3 }
 0x2f8   : > { %v1201_v47 = vpop.f32.mrf.mxu1 }
 0x2f9   : > { %v1326_v15 = vpop.f32.mrf.mxu2  ;;  %v1103_v25 = vpop.f32.mrf.mxu0 }
 0x2fa   : > { %1732 = vmatmul.f32.gmra.mxu2 %v4136_v59 }
 0x2fb   : > { %1830 = vmatmul.f32.gmra.mxu3 %v4133_v51 }
 0x2fc   : > { %1604 = vmatmul.f32.gmra.mxu1 %v4133_v51  ;;  %v4145_v51 = vld [vmem:[#allocation31_spill] sm:$0xff] }
 0x2fd   : > { %1506 = vmatmul.f32.gmra.mxu0 %v4136_v59 }
 0x2fe   : > { %v3561_v29 = vpop.f32.mrf.mxu3 }
 0x300   : > { %v1204_v53 = vpop.f32.mrf.mxu1 }
 0x301   : > { %v1329_v21 = vpop.f32.mrf.mxu2  ;;  %v3571_v62 = vpop.f32.mrf.mxu0 }
 0x302   : > { %4137 = vst [vmem:[#allocation26_spill] sm:$0xff] %v3571_v62  ;;  %1735 = vmatmul.f32.gmra.mxu2 %v4139_v6 }
 0x303   : > { %1833 = vmatmul.f32.gmra.mxu3 %v4135_v39 }
 0x304   : > { %1607 = vmatmul.f32.gmra.mxu1 %v4135_v39 }
 0x305   : > { %1509 = vmatmul.f32.gmra.mxu0 %v4139_v6 }
 0x306   : > { %v3567_v54 = vpop.f32.mrf.mxu3 }
 0x308   : > { %v1207_v43 = vpop.f32.mrf.mxu1 }
 0x309   : > { %v1688_v17 = vpop.f32.mrf.mxu2  ;;  %v3577_v8 = vpop.f32.mrf.mxu0 }
 0x30a   : > { %4140 = vst [vmem:[#allocation35_spill] sm:$0xff] %v3577_v8  ;;  %1738 = vmatmul.f32.gmra.mxu2 %v4142_v49 }
 0x30b   : > { %1836 = vmatmul.f32.gmra.mxu3 %v4138_v44 }
 0x30c   : > { %1610 = vmatmul.f32.gmra.mxu1 %v4138_v44 }
 0x30d   : > { %1512 = vmatmul.f32.gmra.mxu0 %v4142_v49 }
 0x30e   : > { %v1433_v33 = vpop.f32.mrf.mxu3 }
 0x310   : > { %v1210_v41 = vpop.f32.mrf.mxu1 }
 0x311   : > { %v3583_v48 = vpop.f32.mrf.mxu2  ;;  %v3585_v3 = vpop.f32.mrf.mxu0  ;;  %v1211_v6 = vadd.f32 %v1210_v41, %v1097_v42  ;;  %v1202_v41 = vadd.f32 %v1201_v47, %v3515_v7  ;;  %v1431_v47 = vadd.f32 %v3567_v54, %v3535_v35  ;;  %v1190_v35 = vadd.f32 %v3511_v4, %v3460_v60 }
 0x312   : > { %4143 = vst [vmem:[#allocation9_spill] sm:$0xff] %v3585_v3  ;;  %1741 = vmatmul.f32.gmra.mxu2 %v4145_v51  ;;  %v1993_v54 = vmax.f32 %v3537_v24, 0.0  ;;  %v1184_v24 = vadd.f32 %v3491_v20, %v3411_v19  ;;  %v4154_v19 = vld [vmem:[#allocation68_spill] sm:$0xff] }
 0x313   : > { %1839 = vmatmul.f32.gmra.mxu3 %v4141_v57  ;;  %v1178_v20 = vadd.f32 %v3453_v13, %v4154_v19 }
 0x314   : > { %1613 = vmatmul.f32.gmra.mxu1 %v4141_v57  ;;  %v4146_v57 = vld [vmem:[#allocation32_spill] sm:$0xff] }
 0x315   : > { %1515 = vmatmul.f32.gmra.mxu0 %v4145_v51  ;;  %v2013_v51 = vmax.f32 %v1211_v6, 0.0  ;;  %v4151_v6 = vld [vmem:[#allocation38_spill] sm:$0xff] }
 0x316   : > { %v1436_v50 = vpop.f32.mrf.mxu3 }
 0x318   : > { %v1213_v0 = vpop.f32.mrf.mxu1 }
 0x319   : > { %v1214_v10 = vadd.f32 %v1213_v0, %v1100_v46  ;;  %v3591_v59 = vpop.f32.mrf.mxu2  ;;  %v3594_v8 = vpop.f32.mrf.mxu0  ;;  %v4147_v46 = vld [vmem:[#allocation33_spill] sm:$0xff]  ;;  %v1205_v0 = vadd.f32 %v1204_v53, %v3527_v11  ;;  %v1199_v11 = vadd.f32 %v3547_v63, %v3502_v2  ;;  %v4149_v63 = vld [vmem:[#allocation36_spill] sm:$0xff] }
 0x31a   : > { %1744 = vmatmul.f32.gmra.mxu2 %v4147_v46 }
 0x31b   : > { %1842 = vmatmul.f32.gmra.mxu3 %v4144_v16  ;;  %v2017_v49 = vmax.f32 %v1214_v10, 0.0  ;;  %v2005_v53 = vmax.f32 %v1205_v0, 0.0  ;;  %v1977_v0 = vmax.f32 %v1184_v24, 0.0  ;;  %v4168_v24 = vld [vmem:[#allocation52_spill] sm:$0xff] }
 0x31c   : > { %1616 = vmatmul.f32.gmra.mxu1 %v4144_v16  ;;  %v1208_v16 = vadd.f32 %v1207_v43, %v3539_v56  ;;  %v1437_v56 = vadd.f32 %v1436_v50, %v3557_v14  ;;  %v4148_v43 = vld [vmem:[#allocation34_spill] sm:$0xff]  ;;  %v1428_v50 = vadd.f32 %v3561_v29, %v3525_v40  ;;  %v1187_v40 = vadd.f32 %v3500_v52, %v3437_v28 }
 0x31d   : > { %1518 = vmatmul.f32.gmra.mxu0 %v4147_v46  ;;  %v1181_v28 = vadd.f32 %v3476_v22, %v3396_v45  ;;  %v1994_v46 = vmax.f32 %v3544_v27, 0.0  ;;  %v1990_v45 = vmax.f32 %v3532_v26, 0.0  ;;  %v4155_v22 = vld [vmem:[#allocation66_spill] sm:$0xff]  ;;  %v1986_v27 = vmax.f32 %v3520_v30, 0.0 }
 0x31e   : > { %v1439_v9 = vpop.f32.mrf.mxu3  ;;  %v2009_v10 = vmax.f32 %v1208_v16, 0.0  ;;  %v2014_v14 = vmax.f32 %v1437_v56, 0.0  ;;  %v2002_v60 = vmax.f32 %v1428_v50, 0.0  ;;  %v1981_v52 = vmax.f32 %v1187_v40, 0.0  ;;  %v4163_v50 = vld [vmem:[#allocation47_spill] sm:$0xff] }
 0x31f   : > { %v1440_v42 = vadd.f32 %v1439_v9, %v1326_v15  ;;  %v1434_v15 = vadd.f32 %v1433_v33, %v3549_v23  ;;  %v1997_v23 = vmax.f32 %v1199_v11, 0.0  ;;  %v1969_v11 = vmax.f32 %v1178_v20, 0.0 }
 0x320   : > { %v1216_v39 = vpop.f32.mrf.mxu1  ;;  %v1982_v26 = vmax.f32 %v3508_v58, 0.0  ;;  %v1978_v30 = vmax.f32 %v3497_v31, 0.0  ;;  %v1974_v58 = vmax.f32 %v3488_v32, 0.0  ;;  %v1966_v31 = vmax.f32 %v3448_v61, 0.0 }
 0x321   : > { %v1217_v44 = vadd.f32 %v1216_v39, %v1103_v25  ;;  %v3601_v25 = vpop.f32.mrf.mxu2  ;;  %v3612_v7 = vpop.f32.mrf.mxu0  ;;  %v1962_v32 = vmax.f32 %v3423_v1, 0.0 }
 0x322   : > { %1747 = vmatmul.f32.gmra.mxu2 %v4149_v63 }
 0x323   : > { %1845 = vmatmul.f32.gmra.mxu3 %v4146_v57  ;;  %v2021_v62 = vmax.f32 %v1217_v44, 0.0 }
 0x324   : > { %1619 = vmatmul.f32.gmra.mxu1 %v4146_v57  ;;  %v1985_v57 = vmax.f32 %v1190_v35, 0.0  ;;  %v4164_v35 = vld [vmem:[#allocation48_spill] sm:$0xff] }
 0x325   : > { %2047 = vmatpush.msrb.mxu1 %v2021_v62  ;;  %v1193_v62 = vadd.f32 %v3523_v12, %v3479_v37  ;;  %1521 = vmatmul.f32.gmra.mxu0 %v4149_v63  ;;  %v1425_v12 = vadd.f32 %v3553_v38, %v3513_v34  ;;  %v4161_v63 = vld [vmem:[#allocation45_spill] sm:$0xff] }
 0x326   : > { %v1442_v3 = vpop.f32.mrf.mxu3 }
 0x327   : > { %v1443_v18 = vadd.f32 %v1442_v3, %v1329_v21  ;;  %2048 = vmatpush.msrb.mxu1 %v2017_v49  ;;  %v2018_v21 = vmax.f32 %v1440_v42, 0.0  ;;  %v2010_v3 = vmax.f32 %v1434_v15, 0.0  ;;  %v1989_v29 = vmax.f32 %v1193_v62, 0.0  ;;  %v4152_v49 = vld [vmem:[#allocation39_spill] sm:$0xff] }
 0x328   : > { %v1998_v34 = vmax.f32 %v1425_v12, 0.0  ;;  %v4166_v12 = vld [vmem:[#allocation50_spill] sm:$0xff] }
 0x329   : > { %v2022_v39 = vmax.f32 %v1443_v18, 0.0  ;;  %v3604_v44 = vpop.f32.mrf.mxu1  ;;  %2049 = vmatpush.msrb.mxu1 %v2013_v51  ;;  %v2001_v18 = vmax.f32 %v1202_v41, 0.0  ;;  %v3629_v37 = vpop.f32.mrf.mxu2  ;;  %v1973_v41 = vmax.f32 %v1181_v28, 0.0 }
 0x32a   : > { %v3637_v4 = vpop.f32.mrf.mxu0  ;;  %1750 = vmatmul.f32.gmra.mxu2 %v4152_v49 }
 0x32b   : > { %1848 = vmatmul.f32.gmra.mxu3 %v4148_v43  ;;  %2050 = vmatpush.msrb.mxu1 %v2009_v10  ;;  %v4156_v10 = vld [vmem:[#allocation41_spill] sm:$0xff] }
 0x32c   : > { %2087 = vmatpush.msrb.mxu3 %v2022_v39  ;;  %1622 = vmatmul.f32.gmra.mxu1 %v4148_v43  ;;  %v4157_v39 = vld [vmem:[#allocation65_spill] sm:$0xff] }
 0x32d   : > { %2051 = vmatpush.msrb.mxu1 %v2005_v53  ;;  %1524 = vmatmul.f32.gmra.mxu0 %v4152_v49  ;;  %v1172_v56 = vadd.f32 %v3404_v5, %v4157_v39  ;;  %v4158_v53 = vld [vmem:[#allocation42_spill] sm:$0xff] }
 0x32e   : > { %2088 = vmatpush.msrb.mxu3 %v2018_v21  ;;  %v1801_v2 = vpop.f32.mrf.mxu3 }
 0x32f   : > { %v3619_v33 = vadd.f32 %v1801_v2, %v1688_v17  ;;  %2052 = vmatpush.msrb.mxu1 %v2001_v18  ;;  %v2006_v17 = vmax.f32 %v1431_v47, 0.0  ;;  %v1961_v21 = vmax.f32 %v1172_v56, 0.0  ;;  %v4160_v47 = vld [vmem:[#allocation44_spill] sm:$0xff] }
 0x330   : > { %2089 = vmatpush.msrb.mxu3 %v2014_v14 }
 0x331   : > { %4150 = vst [vmem:[#allocation49_spill] sm:$0xff] %v3619_v33  ;;  %v3627_v9 = vpop.f32.mrf.mxu1  ;;  %2053 = vmatpush.msrb.mxu1 %v1997_v23  ;;  %v1703_v42 = vpop.f32.mrf.mxu2 }
 0x332   : > { %2090 = vmatpush.msrb.mxu3 %v2010_v3  ;;  %v3659_v13 = vpop.f32.mrf.mxu0  ;;  %1753 = vmatmul.f32.gmra.mxu2 %v4158_v53 }
 0x333   : > { %1851 = vmatmul.f32.gmra.mxu3 %v4151_v6  ;;  %2054 = vmatpush.msrb.mxu1 %v1993_v54 }
 0x334   : > { %2091 = vmatpush.msrb.mxu3 %v2006_v17  ;;  %1625 = vmatmul.f32.gmra.mxu1 %v4151_v6 }
 0x335   : > { %2055 = vmatpush.msrb.mxu1 %v1989_v29  ;;  %1527 = vmatmul.f32.gmra.mxu0 %v4158_v53  ;;  %v4167_v29 = vld [vmem:[#allocation51_spill] sm:$0xff] }
 0x336   : > { %2092 = vmatpush.msrb.mxu3 %v2002_v60  ;;  %v1804_v38 = vpop.f32.mrf.mxu3  ;;  %v4175_v53 = vld [vmem:[#allocation59_spill] sm:$0xff] }
 0x337   : > { %v3645_v16 = vadd.f32 %v1804_v38, %v3583_v48  ;;  %2056 = vmatpush.msrb.mxu1 %v1985_v57  ;;  %v1175_v48 = vadd.f32 %v3428_v36, %v4155_v22  ;;  %v4169_v38 = vld [vmem:[#allocation53_spill] sm:$0xff] }
 0x338   : > { %2093 = vmatpush.msrb.mxu3 %v1998_v34 }
 0x339   : > { %4153 = vst [vmem:[#allocation46_spill] sm:$0xff] %v3645_v16  ;;  %v3651_v51 = vpop.f32.mrf.mxu1  ;;  %2057 = vmatpush.msrb.mxu1 %v1981_v52  ;;  %v1965_v43 = vmax.f32 %v1175_v48, 0.0  ;;  %v1706_v18 = vpop.f32.mrf.mxu2  ;;  %v4172_v48 = vld [vmem:[#allocation56_spill] sm:$0xff] }
 0x33a   : > { %2094 = vmatpush.msrb.mxu3 %v1994_v46  ;;  %v3676_v14 = vpop.f32.mrf.mxu0  ;;  %1756 = vmatmul.f32.gmra.mxu2 %v4161_v63  ;;  %v4170_v46 = vld [vmem:[#allocation54_spill] sm:$0xff] }
 0x33b   : > { %1854 = vmatmul.f32.gmra.mxu3 %v4156_v10  ;;  %2058 = vmatpush.msrb.mxu1 %v1977_v0  ;;  %v4171_v0 = vld [vmem:[#allocation55_spill] sm:$0xff] }
 0x33c   : > { %2095 = vmatpush.msrb.mxu3 %v1990_v45  ;;  %1628 = vmatmul.f32.gmra.mxu1 %v4156_v10 }
 0x33d   : > { %2059 = vmatpush.msrb.mxu1 %v1973_v41  ;;  %1530 = vmatmul.f32.gmra.mxu0 %v4161_v63 }
 0x33e   : > { %2096 = vmatpush.msrb.mxu3 %v1986_v27  ;;  %v1807_v36 = vpop.f32.mrf.mxu3  ;;  %v4173_v27 = vld [vmem:[#allocation57_spill] sm:$0xff] }
 0x33f   : > { %v3666_v15 = vadd.f32 %v1807_v36, %v3591_v59  ;;  %2060 = vmatpush.msrb.mxu1 %v1969_v11  ;;  %v1970_v59 = vmax.f32 %v3473_v55, 0.0  ;;  %v4174_v11 = vld [vmem:[#allocation58_spill] sm:$0xff] }
 0x340   : > { %2097 = vmatpush.msrb.mxu3 %v1982_v26 }
 0x341   : > { %4159 = vst [vmem:[#allocation43_spill] sm:$0xff] %v3666_v15  ;;  %v3670_v5 = vpop.f32.mrf.mxu1  ;;  %2061 = vmatpush.msrb.mxu1 %v1965_v43  ;;  %v1709_v23 = vpop.f32.mrf.mxu2 }
 0x342   : > { %2098 = vmatpush.msrb.mxu3 %v1978_v30  ;;  %v3689_v61 = vpop.f32.mrf.mxu0  ;;  %1759 = vmatmul.f32.gmra.mxu2 %v4164_v35 }
 0x343   : > { %1857 = vmatmul.f32.gmra.mxu3 %v4160_v47  ;;  %2062 = vmatpush.msrb.mxu1 %v1961_v21  ;;  %v4176_v21 = vld [vmem:[#allocation60_spill] sm:$0xff] }
 0x344   : > { %2099 = vmatpush.msrb.mxu3 %v1974_v58  ;;  %1631 = vmatmul.f32.gmra.mxu1 %v4160_v47  ;;  %v4177_v47 = vld [vmem:[#allocation61_spill] sm:$0xff] }
 0x345   : > { %1533 = vmatmul.f32.gmra.mxu0 %v4164_v35  ;;  %v4180_v35 = vld [vmem:[#allocation64_spill] sm:$0xff] }
 0x346   : > { %2100 = vmatpush.msrb.mxu3 %v1970_v59  ;;  %v1810_v2 = vpop.f32.mrf.mxu3 }
 0x347   : > { %v3681_v62 = vadd.f32 %v1810_v2, %v3601_v25  ;;  %v4178_v2 = vld [vmem:[#allocation62_spill] sm:$0xff] }
 0x348   : > { %2101 = vmatpush.msrb.mxu3 %v1966_v31 }
 0x349   : > { %4162 = vst [vmem:[#allocation10_spill] sm:$0xff] %v3681_v62  ;;  %v3685_v55 = vpop.f32.mrf.mxu1  ;;  %v3698_v54 = vpop.f32.mrf.mxu2 }
 0x34a   : > { %2102 = vmatpush.msrb.mxu3 %v1962_v32  ;;  %v3702_v17 = vpop.f32.mrf.mxu0  ;;  %1762 = vmatmul.f32.gmra.mxu2 %v4167_v29 }
 0x34b   : > { %1860 = vmatmul.f32.gmra.mxu3 %v4163_v50 }
 0x34c   : > { %1634 = vmatmul.f32.gmra.mxu1 %v4163_v50 }
 0x34d   : > { %1536 = vmatmul.f32.gmra.mxu0 %v4167_v29 }
 0x34e   : > { %v1813_v3 = vpop.f32.mrf.mxu3 }
 0x34f   : > { %v3693_v25 = vadd.f32 %v1813_v3, %v3629_v37 }
 0x351   : > { %4165 = vst [vmem:[#allocation40_spill] sm:$0xff] %v3693_v25  ;;  %v3696_v1 = vpop.f32.mrf.mxu1  ;;  %v3710_v60 = vpop.f32.mrf.mxu2 }
 0x352   : > { %v3714_v57 = vpop.f32.mrf.mxu0  ;;  %1765 = vmatmul.f32.gmra.mxu2 %v4169_v38 }
 0x353   : > { %1863 = vmatmul.f32.gmra.mxu3 %v4166_v12 }
 0x354   : > { %1637 = vmatmul.f32.gmra.mxu1 %v4166_v12 }
 0x355   : > { %1539 = vmatmul.f32.gmra.mxu0 %v4169_v38 }
 0x356   : > { %v1816_v40 = vpop.f32.mrf.mxu3 }
 0x357   : > { %v3705_v6 = vadd.f32 %v1816_v40, %v1703_v42 }
 0x359   : > { %v3708_v37 = vpop.f32.mrf.mxu1  ;;  %v3722_v52 = vpop.f32.mrf.mxu2 }
 0x35a   : > { %v3726_v19 = vpop.f32.mrf.mxu0  ;;  %1768 = vmatmul.f32.gmra.mxu2 %v4171_v0 }
 0x35b   : > { %1866 = vmatmul.f32.gmra.mxu3 %v4168_v24 }
 0x35c   : > { %1640 = vmatmul.f32.gmra.mxu1 %v4168_v24 }
 0x35d   : > { %1542 = vmatmul.f32.gmra.mxu0 %v4171_v0 }
 0x35e   : > { %v1819_v34 = vpop.f32.mrf.mxu3 }
 0x35f   : > { %v3717_v49 = vadd.f32 %v1819_v34, %v1706_v18  ;;  %v4181_v34 = vld [vmem:[#allocation11_spill] sm:$0xff] }
 0x361   : > { %v3720_v28 = vpop.f32.mrf.mxu1  ;;  %v3734_v22 = vpop.f32.mrf.mxu2 }
 0x362   : > { %v1498_v41 = vpop.f32.mrf.mxu0  ;;  %1771 = vmatmul.f32.gmra.mxu2 %v4173_v27 }
 0x363   : > { %1869 = vmatmul.f32.gmra.mxu3 %v4170_v46 }
 0x364   : > { %1643 = vmatmul.f32.gmra.mxu1 %v4170_v46 }
 0x365   : > { %1545 = vmatmul.f32.gmra.mxu0 %v4173_v27 }
 0x366   : > { %v1822_v20 = vpop.f32.mrf.mxu3 }
 0x367   : > { %v3729_v42 = vadd.f32 %v1822_v20, %v1709_v23  ;;  %v4179_v23 = vld [vmem:[#allocation63_spill] sm:$0xff] }
 0x369   : > { %v3732_v45 = vpop.f32.mrf.mxu1  ;;  %v3744_v56 = vpop.f32.mrf.mxu2 }
 0x36a   : > { %v1501_v26 = vpop.f32.mrf.mxu0  ;;  %1774 = vmatmul.f32.gmra.mxu2 %v4175_v53 }
 0x36b   : > { %1872 = vmatmul.f32.gmra.mxu3 %v4172_v48 }
 0x36c   : > { %1646 = vmatmul.f32.gmra.mxu1 %v4172_v48  ;;  %v4182_v48 = vld [vmem:[#allocation67_spill] sm:$0xff] }
 0x36d   : > { %1548 = vmatmul.f32.gmra.mxu0 %v4175_v53 }
 0x36e   : > { %v3738_v10 = vpop.f32.mrf.mxu3 }
 0x371   : > { %v3742_v39 = vpop.f32.mrf.mxu1  ;;  %v1727_v30 = vpop.f32.mrf.mxu2 }
 0x372   : > { %v1504_v18 = vpop.f32.mrf.mxu0  ;;  %1777 = vmatmul.f32.gmra.mxu2 %v4177_v47 }
 0x373   : > { %1875 = vmatmul.f32.gmra.mxu3 %v4174_v11 }
 0x374   : > { %1649 = vmatmul.f32.gmra.mxu1 %v4174_v11 }
 0x375   : > { %1551 = vmatmul.f32.gmra.mxu0 %v4177_v47 }
 0x376   : > { %v3748_v36 = vpop.f32.mrf.mxu3 }
 0x379   : > { %v1605_v43 = vpop.f32.mrf.mxu1  ;;  %v1730_v31 = vpop.f32.mrf.mxu2 }
 0x37a   : > { %v1507_v63 = vpop.f32.mrf.mxu0  ;;  %1780 = vmatmul.f32.gmra.mxu2 %v4179_v23 }
 0x37b   : > { %1878 = vmatmul.f32.gmra.mxu3 %v4176_v21 }
 0x37c   : > { %1652 = vmatmul.f32.gmra.mxu1 %v4176_v21 }
 0x37d   : > { %1554 = vmatmul.f32.gmra.mxu0 %v4179_v23  ;;  %v4184_v23 = vld [vmem:[#allocation69_spill] sm:$0xff] }
 0x37e   : > { %v3754_v58 = vpop.f32.mrf.mxu3 }
 0x381   : > { %v1608_v59 = vpop.f32.mrf.mxu1  ;;  %v1733_v3 = vpop.f32.mrf.mxu2 }
 0x382   : > { %v1510_v12 = vpop.f32.mrf.mxu0 }
 0x383   : > { %1881 = vmatmul.f32.gmra.mxu3 %v4178_v2 }
 0x384   : > { %1655 = vmatmul.f32.gmra.mxu1 %v4178_v2 }
 0x386   : > { %v1834_v32 = vpop.f32.mrf.mxu3 }
 0x389   : > { %v1611_v50 = vpop.f32.mrf.mxu1  ;;  %v1736_v24 = vpop.f32.mrf.mxu2 }
 0x38a   : > { %v1513_v38 = vpop.f32.mrf.mxu0  ;;  %v1612_v16 = vadd.f32 %v1611_v50, %v1498_v41 }
 0x38b   : > { %1884 = vmatmul.f32.gmra.mxu3 %v4180_v35 }
 0x38c   : > { %1658 = vmatmul.f32.gmra.mxu1 %v4180_v35 }
 0x38e   : > { %v1837_v40 = vpop.f32.mrf.mxu3 }
 0x38f   : > { %v1838_v41 = vadd.f32 %v1837_v40, %v3744_v56  ;;  %v1588_v40 = vadd.f32 %v3685_v55, %v3612_v7 }
 0x391   : > { %v1614_v29 = vpop.f32.mrf.mxu1  ;;  %v3766_v0 = vpop.f32.mrf.mxu2  ;;  %v1948_v56 = vmax.f32 %v1838_v41, 0.0  ;;  %v1915_v55 = vmax.f32 %v1588_v40, 0.0 }
 0x392   : > { %v3770_v27 = vpop.f32.mrf.mxu0  ;;  %v1615_v35 = vadd.f32 %v1614_v29, %v1501_v26  ;;  %v1606_v26 = vadd.f32 %v1605_v43, %v3714_v57  ;;  %v1947_v29 = vmax.f32 %v1612_v16, 0.0  ;;  %v1600_v16 = vadd.f32 %v3732_v45, %v3689_v61 }
 0x393   : > { %1887 = vmatmul.f32.gmra.mxu3 %v4181_v34 }
 0x394   : > { %1661 = vmatmul.f32.gmra.mxu1 %v4181_v34  ;;  %v1939_v57 = vmax.f32 %v1606_v26, 0.0 }
 0x396   : > { %v1840_v46 = vpop.f32.mrf.mxu3 }
 0x399   : > { %v1617_v20 = vpop.f32.mrf.mxu1  ;;  %v3772_v2 = vpop.f32.mrf.mxu2 }
 0x39a   : > { %v1618_v53 = vadd.f32 %v1617_v20, %v1504_v18  ;;  %4183 = vst [vmem:[#allocation7_spill] sm:$0xff] %v3772_v2  ;;  %v3776_v25 = vpop.f32.mrf.mxu0  ;;  %v1609_v18 = vadd.f32 %v1608_v59, %v3726_v19  ;;  %v1951_v20 = vmax.f32 %v1615_v35, 0.0  ;;  %v4187_v35 = vld [vmem:[#allocation26_spill] sm:$0xff] }
 0x39b   : > { %1890 = vmatmul.f32.gmra.mxu3 %v4182_v48 }
 0x39c   : > { %1664 = vmatmul.f32.gmra.mxu1 %v4182_v48  ;;  %v1955_v34 = vmax.f32 %v1618_v53, 0.0 }
 0x39e   : > { %v1843_v11 = vpop.f32.mrf.mxu3 }
 0x39f   : > { %v1844_v62 = vadd.f32 %v1843_v11, %v1730_v31  ;;  %v1943_v31 = vmax.f32 %v1609_v18, 0.0  ;;  %v4185_v11 = vld [vmem:[#allocation9_spill] sm:$0xff] }
 0x3a0   : > { %v1582_v7 = vadd.f32 %v3651_v51, %v4185_v11  ;;  %v1576_v51 = vadd.f32 %v3604_v44, %v4187_v35  ;;  %v4191_v44 = vld [vmem:[#allocation43_spill] sm:$0xff] }
 0x3a1   : > { %v1620_v21 = vpop.f32.mrf.mxu1  ;;  %v3785_v19 = vpop.f32.mrf.mxu2 }
 0x3a2   : > { %v1621_v47 = vadd.f32 %v1620_v21, %v1507_v63  ;;  %v1841_v63 = vadd.f32 %v1840_v46, %v1727_v30  ;;  %v1835_v30 = vadd.f32 %v1834_v32, %v3734_v22  ;;  %v1829_v22 = vadd.f32 %v3748_v36, %v3710_v60  ;;  %v3798_v45 = vpop.f32.mrf.mxu0 }
 0x3a3   : > { %1893 = vmatmul.f32.gmra.mxu3 %v4184_v23  ;;  %v1591_v60 = vadd.f32 %v3696_v1, %v3637_v4  ;;  %v1928_v1 = vmax.f32 %v3729_v42, 0.0  ;;  %v1920_v42 = vmax.f32 %v3705_v6, 0.0 }
 0x3a4   : > { %v1959_v33 = vmax.f32 %v1621_v47, 0.0  ;;  %1667 = vmatmul.f32.gmra.mxu1 %v4184_v23  ;;  %v1952_v59 = vmax.f32 %v1841_v63, 0.0  ;;  %v1944_v32 = vmax.f32 %v1835_v30, 0.0  ;;  %v4186_v23 = vld [vmem:[#allocation35_spill] sm:$0xff] }
 0x3a5   : > { %v1919_v4 = vmax.f32 %v1591_v60, 0.0 }
 0x3a6   : > { %v1846_v15 = vpop.f32.mrf.mxu3  ;;  %2107 = vmatpush.msra.mxu0 %v1959_v33  ;;  %v1956_v33 = vmax.f32 %v1844_v62, 0.0  ;;  %v1832_v62 = vadd.f32 %v3754_v58, %v3722_v52  ;;  %v1594_v52 = vadd.f32 %v3708_v37, %v3659_v13  ;;  %v1931_v58 = vmax.f32 %v1600_v16, 0.0  ;;  %v4193_v16 = vld [vmem:[#allocation49_spill] sm:$0xff] }
 0x3a7   : > { %v1847_v48 = vadd.f32 %v1846_v15, %v1733_v3  ;;  %v1603_v15 = vadd.f32 %v3742_v39, %v3702_v17  ;;  %v1597_v17 = vadd.f32 %v3720_v28, %v3676_v14  ;;  %v1826_v14 = vadd.f32 %v3738_v10, %v3698_v54 }
 0x3a8   : > { %2108 = vmatpush.msra.mxu0 %v1955_v34  ;;  %v1940_v28 = vmax.f32 %v1832_v62, 0.0  ;;  %v1923_v13 = vmax.f32 %v1594_v52, 0.0  ;;  %v1585_v54 = vadd.f32 %v3670_v5, %v3594_v8  ;;  %v1579_v8 = vadd.f32 %v3627_v9, %v4186_v23 }
 0x3a9   : > { %v1960_v21 = vmax.f32 %v1847_v48, 0.0  ;;  %v1623_v2 = vpop.f32.mrf.mxu1  ;;  %v1935_v39 = vmax.f32 %v1603_v15, 0.0  ;;  %v1927_v36 = vmax.f32 %v1597_v17, 0.0  ;;  %v1907_v34 = vmax.f32 %v1582_v7, 0.0  ;;  %v4192_v15 = vld [vmem:[#allocation46_spill] sm:$0xff] }
 0x3aa   : > { %v3780_v53 = vadd.f32 %v1623_v2, %v1510_v12  ;;  %2109 = vmatpush.msra.mxu0 %v1951_v20  ;;  %v1936_v12 = vmax.f32 %v1829_v22, 0.0  ;;  %v1525_v2 = vpop.f32.mrf.mxu0  ;;  %v1911_v5 = vmax.f32 %v1585_v54, 0.0  ;;  %v4189_v20 = vld [vmem:[#allocation7_spill] sm:$0xff]  ;;  %v1903_v63 = vmax.f32 %v1579_v8, 0.0 }
 0x3ab   : > { %2147 = vmatpush.msra.mxu2 %v1960_v21  ;;  %v4190_v21 = vld [vmem:[#allocation10_spill] sm:$0xff] }
 0x3ac   : > { %2110 = vmatpush.msra.mxu0 %v1947_v29  ;;  %v1912_v26 = vmax.f32 %v4190_v21, 0.0  ;;  %v1899_v29 = vmax.f32 %v1576_v51, 0.0 }
 0x3ad   : > { %2148 = vmatpush.msra.mxu2 %v1956_v33  ;;  %v1908_v33 = vmax.f32 %v4191_v44, 0.0 }
 0x3ae   : > { %v1849_v43 = vpop.f32.mrf.mxu3  ;;  %2111 = vmatpush.msra.mxu0 %v1943_v31  ;;  %v1904_v31 = vmax.f32 %v4192_v15, 0.0 }
 0x3af   : > { %v3792_v50 = vadd.f32 %v1849_v43, %v1736_v24  ;;  %2149 = vmatpush.msra.mxu2 %v1952_v59  ;;  %v1748_v24 = vpop.f32.mrf.mxu2 }
 0x3b0   : > { %2112 = vmatpush.msra.mxu0 %v1939_v57  ;;  %v1900_v57 = vmax.f32 %v4193_v16, 0.0 }
 0x3b1   : > { %2150 = vmatpush.msra.mxu2 %v1948_v56  ;;  %v1626_v61 = vpop.f32.mrf.mxu1 }
 0x3b2   : > { %v3802_v3 = vadd.f32 %v1626_v61, %v1513_v38  ;;  %2113 = vmatpush.msra.mxu0 %v1935_v39  ;;  %v1932_v38 = vmax.f32 %v1826_v14, 0.0  ;;  %v1528_v30 = vpop.f32.mrf.mxu0 }
 0x3b3   : > { %2151 = vmatpush.msra.mxu2 %v1944_v32 }
 0x3b4   : > { %2114 = vmatpush.msra.mxu0 %v1931_v58 }
 0x3b5   : > { %2152 = vmatpush.msra.mxu2 %v1940_v28 }
 0x3b6   : > { %v1852_v37 = vpop.f32.mrf.mxu3  ;;  %2115 = vmatpush.msra.mxu0 %v1927_v36 }
 0x3b7   : > { %v3811_v46 = vadd.f32 %v1852_v37, %v3766_v0  ;;  %2153 = vmatpush.msra.mxu2 %v1936_v12  ;;  %v1924_v0 = vmax.f32 %v3717_v49, 0.0  ;;  %v1751_v9 = vpop.f32.mrf.mxu2 }
 0x3b8   : > { %2116 = vmatpush.msra.mxu0 %v1923_v13 }
 0x3b9   : > { %2154 = vmatpush.msra.mxu2 %v1932_v38  ;;  %v1629_v10 = vpop.f32.mrf.mxu1 }
 0x3ba   : > { %v3819_v47 = vadd.f32 %v1629_v10, %v3770_v27  ;;  %2117 = vmatpush.msra.mxu0 %v1919_v4  ;;  %v4188_v27 = vld [vmem:[#allocation40_spill] sm:$0xff]  ;;  %v1531_v22 = vpop.f32.mrf.mxu0 }
 0x3bb   : > { %2155 = vmatpush.msra.mxu2 %v1928_v1  ;;  %v1916_v18 = vmax.f32 %v4188_v27, 0.0 }
 0x3bc   : > { %2118 = vmatpush.msra.mxu0 %v1915_v55 }
 0x3bd   : > { %2156 = vmatpush.msra.mxu2 %v1924_v0 }
 0x3be   : > { %v1855_v48 = vpop.f32.mrf.mxu3  ;;  %2119 = vmatpush.msra.mxu0 %v1911_v5 }
 0x3bf   : > { %v3829_v49 = vadd.f32 %v1855_v48, %v4189_v20  ;;  %2157 = vmatpush.msra.mxu2 %v1920_v42  ;;  %v1754_v56 = vpop.f32.mrf.mxu2 }
 0x3c0   : > { %2120 = vmatpush.msra.mxu0 %v1907_v34 }
 0x3c1   : > { %2158 = vmatpush.msra.mxu2 %v1916_v18  ;;  %v1632_v6 = vpop.f32.mrf.mxu1 }
 0x3c2   : > { %v3833_v41 = vadd.f32 %v1632_v6, %v3776_v25  ;;  %2121 = vmatpush.msra.mxu0 %v1903_v63  ;;  %v1534_v28 = vpop.f32.mrf.mxu0 }
 0x3c3   : > { %2159 = vmatpush.msra.mxu2 %v1912_v26 }
 0x3c4   : > { %2122 = vmatpush.msra.mxu0 %v1899_v29 }
 0x3c5   : > { %2160 = vmatpush.msra.mxu2 %v1908_v33 }
 0x3c6   : > { %v1858_v59 = vpop.f32.mrf.mxu3 }
 0x3c7   : > { %v3839_v43 = vadd.f32 %v1858_v59, %v3785_v19  ;;  %2161 = vmatpush.msra.mxu2 %v1904_v31  ;;  %v1757_v52 = vpop.f32.mrf.mxu2  ;;  %v2025_v31 = vld [vmem:[%s3908_s3] sm:$0xff] }
 0x3c8   : > { %2083 = vmatmul.f32.vlgmr.msrb.gmra.mxu2 %v2025_v31  ;;  %2043 = vmatmul.f32.vlgmr.msrb.gmra.mxu0 %v2025_v31 }
 0x3c9   : > { %2162 = vmatpush.msra.mxu2 %v1900_v57  ;;  %v1635_v62 = vpop.f32.mrf.mxu1 }
 0x3ca   : > { %v3842_v25 = vadd.f32 %v1635_v62, %v3798_v45  ;;  %v1537_v37 = vpop.f32.mrf.mxu0 }
 0x3ce   : > { %v1861_v17 = vpop.f32.mrf.mxu3 }
 0x3cf   : > { %v3844_v39 = vadd.f32 %v1861_v17, %v1748_v24  ;;  %v1760_v12 = vpop.f32.mrf.mxu2 }
 0x3d0   : > { %2163 = vmatmul.f32.vlgmr.msra.gmra.mxu2 %v2025_v31  ;;  %2123 = vmatmul.f32.vlgmr.msra.gmra.mxu0 %v2025_v31 }
 0x3d1   : > { %v1638_v32 = vpop.f32.mrf.mxu1 }
 0x3d2   : > { %v3846_v61 = vadd.f32 %v1638_v32, %v1525_v2  ;;  %v1540_v10 = vpop.f32.mrf.mxu0 }
 0x3d6   : > { %v1864_v58 = vpop.f32.mrf.mxu3 }
 0x3d7   : > { %v3848_v14 = vadd.f32 %v1864_v58, %v1751_v9  ;;  %v3858_v54 = vpop.f32.mrf.mxu2 }
 0x3d9   : > { %v1641_v19 = vpop.f32.mrf.mxu1 }
 0x3da   : > { %v3850_v60 = vadd.f32 %v1641_v19, %v1528_v30  ;;  %v1543_v23 = vpop.f32.mrf.mxu0  ;;  %v3872_v30 = vld [vmem:[%s3908_s3 + $0x8] sm:$0xff] }
 0x3db   : > { %2103 = vmatmul.f32.vlgmr.msrb.gmra.mxu3 %v3872_v30  ;;  %2063 = vmatmul.f32.vlgmr.msrb.gmra.mxu1 %v3872_v30 }
 0x3de   : > { %v1867_v36 = vpop.f32.mrf.mxu3 }
 0x3df   : > { %v3852_v45 = vadd.f32 %v1867_v36, %v1754_v56  ;;  %v1766_v0 = vpop.f32.mrf.mxu2 }
 0x3e1   : > { %v1644_v40 = vpop.f32.mrf.mxu1 }
 0x3e2   : > { %v3854_v13 = vadd.f32 %v1644_v40, %v1531_v22  ;;  %v1546_v51 = vpop.f32.mrf.mxu0 }
 0x3e6   : > { %v1870_v24 = vpop.f32.mrf.mxu3 }
 0x3e7   : > { %v3856_v38 = vadd.f32 %v1870_v24, %v1757_v52  ;;  %v1769_v5 = vpop.f32.mrf.mxu2 }
 0x3e9   : > { %v1647_v4 = vpop.f32.mrf.mxu1 }
 0x3ea   : > { %v3860_v1 = vadd.f32 %v1647_v4, %v1534_v28  ;;  %v1549_v18 = vpop.f32.mrf.mxu0 }
 0x3ee   : > { %v1873_v11 = vpop.f32.mrf.mxu3 }
 0x3ef   : > { %v3862_v7 = vadd.f32 %v1873_v11, %v1760_v12  ;;  %v1772_v48 = vpop.f32.mrf.mxu2 }
 0x3f1   : > { %v1650_v55 = vpop.f32.mrf.mxu1 }
 0x3f2   : > { %v1552_v21 = vpop.f32.mrf.mxu0 }
 0x3f6   : > { %v3864_v2 = vpop.f32.mrf.mxu3 }
 0x3f7   : > { %v1775_v63 = vpop.f32.mrf.mxu2 }
 0x3f9   : > { %v1653_v8 = vpop.f32.mrf.mxu1 }
 0x3fa   : > { %v1555_v33 = vpop.f32.mrf.mxu0  ;;  %v1654_v40 = vadd.f32 %v1653_v8, %v1540_v10  ;;  %v1877_v10 = vadd.f32 %v3864_v2, %v3858_v54  ;;  %v1983_v54 = vmax.f32 %v3846_v61, 0.0  ;;  %v1992_v2 = vmax.f32 %v3856_v38, 0.0 }
 0x3fb   : > { %v1980_v61 = vmax.f32 %v3844_v39, 0.0  ;;  %v1967_v38 = vmax.f32 %v3802_v3, 0.0 }
 0x3fe   : > { %v1879_v42 = vpop.f32.mrf.mxu3 }
 0x3ff   : > { %v1778_v29 = vpop.f32.mrf.mxu2 }
 0x401   : > { %v1656_v35 = vpop.f32.mrf.mxu1 }
 0x402   : > { %v1657_v19 = vadd.f32 %v1656_v35, %v1543_v23  ;;  %v1880_v23 = vadd.f32 %v1879_v42, %v1766_v0  ;;  %v1987_v0 = vmax.f32 %v3850_v60, 0.0  ;;  %v1996_v42 = vmax.f32 %v3862_v7, 0.0 }
 0x403   : > { %v1984_v60 = vmax.f32 %v3848_v14, 0.0  ;;  %v1971_v7 = vmax.f32 %v3819_v47, 0.0  ;;  %v1968_v14 = vmax.f32 %v3811_v46, 0.0  ;;  %v1964_v47 = vmax.f32 %v3792_v50, 0.0 }
 0x406   : > { %v1882_v34 = vpop.f32.mrf.mxu3 }
 0x407   : > { %v1781_v56 = vpop.f32.mrf.mxu2 }
 0x409   : > { %v1659_v27 = vpop.f32.mrf.mxu1 }
 0x40a   : > { %v1660_v22 = vadd.f32 %v1659_v27, %v1546_v51  ;;  %v1883_v51 = vadd.f32 %v1882_v34, %v1769_v5  ;;  %v2000_v5 = vmax.f32 %v1877_v10, 0.0  ;;  %v1975_v34 = vmax.f32 %v3833_v41, 0.0 }
 0x40b   : > { %v1972_v41 = vmax.f32 %v3829_v49, 0.0 }
 0x40c   : > { %v2011_v24 = vmax.f32 %v1660_v22, 0.0  ;;  %v2008_v8 = vmax.f32 %v1883_v51, 0.0 }
 0x40e   : > { %v1885_v20 = vpop.f32.mrf.mxu3 }
 0x40f   : > { %v1886_v4 = vadd.f32 %v1885_v20, %v1772_v48  ;;  %v1995_v48 = vmax.f32 %v3860_v1, 0.0  ;;  %v1979_v1 = vmax.f32 %v3842_v25, 0.0  ;;  %v1976_v25 = vmax.f32 %v3839_v43, 0.0 }
 0x411   : > { %v1662_v9 = vpop.f32.mrf.mxu1  ;;  %v2012_v35 = vmax.f32 %v1886_v4, 0.0 }
 0x412   : > { %v1663_v57 = vadd.f32 %v1662_v9, %v1549_v18  ;;  %v1651_v18 = vadd.f32 %v1650_v55, %v1537_v37  ;;  %v2007_v9 = vmax.f32 %v1657_v19, 0.0  ;;  %v2004_v37 = vmax.f32 %v1880_v23, 0.0 }
 0x413   : > { %v1991_v55 = vmax.f32 %v3854_v13, 0.0  ;;  %v1988_v13 = vmax.f32 %v3852_v45, 0.0  ;;  %v1963_v45 = vmax.f32 %v3780_v53, 0.0 }
 0x414   : > { %v2015_v28 = vmax.f32 %v1663_v57, 0.0 }
 0x416   : > { %v1888_v26 = vpop.f32.mrf.mxu3 }
 0x417   : > { %v1889_v36 = vadd.f32 %v1888_v26, %v1775_v63  ;;  %v1999_v63 = vmax.f32 %v1651_v18, 0.0 }
 0x419   : > { %v1665_v6 = vpop.f32.mrf.mxu1  ;;  %v2016_v27 = vmax.f32 %v1889_v36, 0.0 }
 0x41a   : > { %v1666_v15 = vadd.f32 %v1665_v6, %v1552_v21  ;;  %v2003_v21 = vmax.f32 %v1654_v40, 0.0 }
 0x41c   : > { %v2019_v62 = vmax.f32 %v1666_v15, 0.0 }
 0x41e   : > { %v1891_v44 = vpop.f32.mrf.mxu3 }
 0x41f   : > { %v1892_v52 = vadd.f32 %v1891_v44, %v1778_v29  ;;  %v2201_v44 = vlaneseq }
 0x421   : > { %v1668_v59 = vpop.f32.mrf.mxu1  ;;  %v2020_v11 = vmax.f32 %v1892_v52, 0.0  ;;  %vm2203_vm4 = vcmp.lt.s32.totalorder %v2201_v44, 512 }
 0x422   : > { %v1669_v16 = vadd.f32 %v1668_v59, %v1555_v33 }
 0x424   : > { %v2023_v17 = vmax.f32 %v1669_v16, 0.0 }
 0x426   : > { %v1894_v32 = vpop.f32.mrf.mxu3  ;;  %2127 = vmatpush.msra.mxu1 %v2023_v17 }
 0x427   : > { %v1895_v58 = vadd.f32 %v1894_v32, %v1781_v56 }
 0x428   : > { %2128 = vmatpush.msra.mxu1 %v2019_v62 }
 0x429   : > { %v2024_v12 = vmax.f32 %v1895_v58, 0.0 }
 0x42a   : > { %2129 = vmatpush.msra.mxu1 %v2015_v28 }
 0x42b   : > { %2167 = vmatpush.msra.mxu3 %v2024_v12 }
 0x42c   : > { %2130 = vmatpush.msra.mxu1 %v2011_v24 }
 0x42d   : > { %2168 = vmatpush.msra.mxu3 %v2020_v11 }
 0x42e   : > { %2131 = vmatpush.msra.mxu1 %v2007_v9 }
 0x42f   : > { %2169 = vmatpush.msra.mxu3 %v2016_v27 }
 0x430   : > { %2132 = vmatpush.msra.mxu1 %v2003_v21 }
 0x431   : > { %2170 = vmatpush.msra.mxu3 %v2012_v35 }
 0x432   : > { %2133 = vmatpush.msra.mxu1 %v1999_v63 }
 0x433   : > { %2171 = vmatpush.msra.mxu3 %v2008_v8 }
 0x434   : > { %2134 = vmatpush.msra.mxu1 %v1995_v48 }
 0x435   : > { %2172 = vmatpush.msra.mxu3 %v2004_v37 }
 0x436   : > { %2135 = vmatpush.msra.mxu1 %v1991_v55 }
 0x437   : > { %2173 = vmatpush.msra.mxu3 %v2000_v5 }
 0x438   : > { %2136 = vmatpush.msra.mxu1 %v1987_v0 }
 0x439   : > { %2174 = vmatpush.msra.mxu3 %v1996_v42 }
 0x43a   : > { %2137 = vmatpush.msra.mxu1 %v1983_v54 }
 0x43b   : > { %2175 = vmatpush.msra.mxu3 %v1992_v2 }
 0x43c   : > { %2138 = vmatpush.msra.mxu1 %v1979_v1 }
 0x43d   : > { %2176 = vmatpush.msra.mxu3 %v1988_v13 }
 0x43e   : > { %2139 = vmatpush.msra.mxu1 %v1975_v34 }
 0x43f   : > { %2177 = vmatpush.msra.mxu3 %v1984_v60 }
 0x440   : > { %2140 = vmatpush.msra.mxu1 %v1971_v7 }
 0x441   : > { %2178 = vmatpush.msra.mxu3 %v1980_v61 }
 0x442   : > { %2141 = vmatpush.msra.mxu1 %v1967_v38 }
 0x443   : > { %2179 = vmatpush.msra.mxu3 %v1976_v25 }
 0x444   : > { %2142 = vmatpush.msra.mxu1 %v1963_v45 }
 0x445   : > { %2180 = vmatpush.msra.mxu3 %v1972_v41  ;;  %2143 = vmatmul.f32.vlgmr.msra.gmra.mxu1 %v3872_v30  ;;  %v2044_v3 = vpop.f32.mrf.mxu0 }
 0x447   : > { %2181 = vmatpush.msra.mxu3 %v1968_v14 }
 0x449   : > { %2182 = vmatpush.msra.mxu3 %v1964_v47 }
 0x44a   : > { %2183 = vmatmul.f32.vlgmr.msra.gmra.mxu3 %v3872_v30 }
 0x44b   : > { %v2084_v39 = vpop.f32.mrf.mxu2 }
 0x44d   : > { %v2124_v20 = vpop.f32.mrf.mxu0 }
 0x453   : > { %v2164_v29 = vpop.f32.mrf.mxu2 }
 0x458   : > { %v2064_v43 = vpop.f32.mrf.mxu1 }
 0x459   : > { %v2065_v33 = vadd.f32 %v2064_v43, %v2044_v3 }
 0x45e   : > { %v2104_v53 = vpop.f32.mrf.mxu3 }
 0x45f   : > { %v2105_v26 = vadd.f32 %v2104_v53, %v2084_v39 }
 0x461   : > { %v2191_v15 = vrot.slane %v2105_v26, 7 }
 0x463   : > { %v2195_v30 = vsel %vm2194_vm1, %v2065_v33, %v2191_v15 }
 0x4c2   : > { %v2144_v49 = vpop.f32.mrf.mxu1 }
 0x4c3   : > { %v2145_v6 = vadd.f32 %v2144_v49, %v2124_v20 }
 0x4c5   : > { %v2192_v31 = vrot.slane %v2145_v6, 6 }
 0x4cd   : > { %v2184_v46 = vpop.f32.mrf.mxu3 }
 0x4ce   : > { %v2185_v50 = vadd.f32 %v2184_v46, %v2164_v29 }
 0x4d0   : > { %v2193_v59 = vrot.slane %v2185_v50, 5 }
 0x4d2   : > { %v2197_v16 = vsel %vm2196_vm2, %v2192_v31, %v2193_v59 }
 0x4d3   : > { %v2199_v57 = vsel %vm2198_vm3, %v2195_v30, %v2197_v16 }
 0x4d4   : > { %2205 = vst.msk [vmem:[%s214_s27] sm:$0xf] %vm2203_vm4, %v2199_v57 }
 0x4d5 PF: > { %s15_s15 = sadd.s32 1, %s2469_s15  }
 0x4d6   : > { %p12_p7 = scmp.ge.s32.totalorder %s15_s15, 4  }
 0x4d8   :  { %14 = sbr.rel (!%p12_p7) target bundleno = 1 (0x1), region = 71 }
 0x4dd   :  { %2226 = vsyncpa [#allocation3], 1 }
 0x4de   :  { %2228 = vsyncpa [#allocation3 + $0x1], 1 }

</bundles_post_ra>
